<compile_context>
chip_gen: v7x
topology: tpu7x:2x2x1
jax: 0.10.0
libtpu: 0.0.40
codegen_flags: <defaults>
</compile_context>

<pallas_src>
import numpy as np
import jax
import jax.numpy as jnp
from jax.experimental import pallas as pl
from jax.experimental.pallas import tpu as pltpu

# ----------------------------- module constants -----------------------------
L_SIMPLE_WEIGHT = 1.0
ORIGINAL_ELBO_WEIGHT = 1.0
V_POSTERIOR = 0.0
NUM_TIMESTEPS = 1000
LINEAR_START = 1e-4
LINEAR_END = 2e-2
UNCOND = 0.05
CONTEXT_DIM = 768
DELTAC_DIM = 2          # cc_projection is Linear(770, 768): 768 (clip) + 2 (deltac)


# ----------------------------- diffusion schedule ----------------------------
def make_schedule():
    # LDM "linear" beta schedule: linspace(sqrt(start), sqrt(end), T)**2
    betas = np.linspace(LINEAR_START ** 0.5, LINEAR_END ** 0.5, NUM_TIMESTEPS,
                        dtype=np.float64) ** 2
    alphas = 1.0 - betas
    acp = np.cumprod(alphas, axis=0)
    acp_prev = np.append(1.0, acp[:-1])
    sqrt_acp = np.sqrt(acp)
    sqrt_1m_acp = np.sqrt(1.0 - acp)
    post_var = ((1.0 - V_POSTERIOR) * betas * (1.0 - acp_prev) / (1.0 - acp)
                + V_POSTERIOR * betas)
    with np.errstate(divide="ignore", invalid="ignore"):
        lvlb = betas ** 2 / (2.0 * post_var * alphas * (1.0 - acp))
    lvlb[0] = lvlb[1]
    return (jnp.asarray(sqrt_acp, jnp.float32),
            jnp.asarray(sqrt_1m_acp, jnp.float32),
            jnp.asarray(lvlb, jnp.float32))


# ------------------------------ parameter setup ------------------------------
def make_params(latent_channels):
    c = latent_channels
    k = jax.random.PRNGKey(42)
    k1, k2, k3, k4 = jax.random.split(k, 4)
    # cc_projection: Linear(770, 768) with weight[:768,:768]=eye and bias=0
    # (nn.init.eye_ / zeros_ in the reference). The eye block is exploited as a
    # skip connection in the conditioning kernel; only the 2 deltac columns
    # (a rank-2 update) are kept as an explicit weight.
    w_cc_tail = 0.02 * jax.random.normal(k1, (DELTAC_DIM, CONTEXT_DIM), jnp.float32)
    b_cc = jnp.zeros((1, CONTEXT_DIM), jnp.float32)
    # CLIP-image-embedder surrogate: pooled latent (C) -> 768
    w_clip = 0.05 * jax.random.normal(k2, (c, CONTEXT_DIM), jnp.float32)
    b_clip = jnp.zeros((1, CONTEXT_DIM), jnp.float32)
    # UNet surrogate: context 768 -> per-sample channel bias (C), 1x1 conv 2C -> C
    w_ctx = 0.05 * jax.random.normal(k3, (CONTEXT_DIM, c), jnp.float32)
    b_ctx = jnp.zeros((1, c), jnp.float32)
    w_unet = 0.1 * jax.random.normal(k4, (2 * c, c), jnp.float32)
    # channel-major split form used by the fused kernel (bf16 MXU operands):
    #   est = Wa @ perturbed + Wb @ masked_cond  (channel concat == row split)
    w_unet_a = w_unet[:c, :].T.astype(jnp.bfloat16)    # (C, C) on the noisy latent
    w_unet_b = w_unet[c:, :].T.astype(jnp.bfloat16)    # (C, C) on the cond latent
    null_prompt = 0.02 * jax.random.normal(jax.random.PRNGKey(7),
                                           (1, CONTEXT_DIM), jnp.float32)
    return dict(w_cc_tail=w_cc_tail, b_cc=b_cc, w_clip=w_clip, b_clip=b_clip,
                w_ctx=w_ctx, b_ctx=b_ctx, w_unet_a=w_unet_a, w_unet_b=w_unet_b,
                null_prompt=null_prompt)


def pick_hw_tile(hw):
    """Largest lane-dense HW tile (<=512) that divides HW; whole HW if small."""
    if hw <= 512:
        return hw
    for th in (512, 384, 256, 128):
        if hw % th == 0:
            return th
    return hw


# ------------------------------- Pallas kernels -------------------------------
def pallas_inv_std(z3, th):
    """1 / std(z) (unbiased, matches torch .std()).

    Streaming single-pass sum & sum-of-squares: grid over (N, HW tiles), one
    (C, th) block per step, VMEM (1,1) accumulators with pl.when init/finalize.
    """
    N, C, HW = z3.shape
    nhw = HW // th
    n_total = N * C * HW

    def kernel(z_ref, o_ref, s_acc, q_acc):
        b = pl.program_id(0)
        h = pl.program_id(1)

        @pl.when((b == 0) & (h == 0))
        def _():
            s_acc[...] = jnp.zeros_like(s_acc)
            q_acc[...] = jnp.zeros_like(q_acc)

        z = z_ref[...]                                            # (C, th)
        s_acc[...] += jnp.sum(jnp.sum(z, axis=1, keepdims=True),
                              axis=0, keepdims=True)
        q_acc[...] += jnp.sum(jnp.sum(z * z, axis=1, keepdims=True),
                              axis=0, keepdims=True)

        @pl.when((b == pl.num_programs(0) - 1) & (h == pl.num_programs(1) - 1))
        def _():
            s = s_acc[...]
            var = (q_acc[...] - s * s * (1.0 / n_total)) * (1.0 / (n_total - 1))
            o_ref[...] = jax.lax.rsqrt(var)

    return pl.pallas_call(
        kernel,
        out_shape=jax.ShapeDtypeStruct((1, 1), jnp.float32),
        grid=(N, nhw),
        in_specs=[pl.BlockSpec((None, C, th), lambda b, h: (b, 0, h))],
        out_specs=pl.BlockSpec((1, 1), lambda b, h: (0, 0)),
        scratch_shapes=[pltpu.VMEM((1, 1), jnp.float32),
                        pltpu.VMEM((1, 1), jnp.float32)],
        compiler_params=pltpu.CompilerParams(
            dimension_semantics=("arbitrary", "arbitrary")),   # pure reduction
    )(z3)


def cond_kernel(pooled_ref, psel_ref, nullp_ref, deltac_ref,
                w_clip_ref, b_clip_ref, w_cct_ref, b_cc_ref,
                w_ctx_ref, b_ctx_ref, o_ref):
    # CLIP-image-embedder surrogate: pooled (N,C) @ (C,768) + b
    clip = (jnp.dot(pooled_ref[...], w_clip_ref[...],
                    preferred_element_type=jnp.float32) + b_clip_ref[...])
    # classifier-free-guidance prompt drop (psel in {0,1}): null prompt where 1
    psel = psel_ref[...]                                          # (N, 1)
    emb = psel * nullp_ref[...] + (1.0 - psel) * clip             # (N, 768)
    # cc_projection Linear(770,768) with eye-init top block and zero bias:
    #   context = emb @ I + deltac @ W_tail + b  ==  emb + deltac @ W_tail + b
    ctx = (emb
           + jnp.dot(deltac_ref[...], w_cct_ref[...],
                     preferred_element_type=jnp.float32)
           + b_cc_ref[...])                                       # (N, 768)
    # context -> per-sample channel bias used by the UNet surrogate
    o_ref[...] = (jnp.dot(ctx, w_ctx_ref[...],
                          preferred_element_type=jnp.float32) + b_ctx_ref[...])


def pallas_conditioning(pooled, psel, deltac, p):
    N, C = pooled.shape

    def full(shape):
        return pl.BlockSpec(tuple(shape), lambda i: tuple(0 for _ in shape))

    return pl.pallas_call(
        cond_kernel,
        out_shape=jax.ShapeDtypeStruct((N, C), jnp.float32),
        grid=(1,),
        in_specs=[full(pooled.shape), full(psel.shape), full(p["null_prompt"].shape),
                  full(deltac.shape), full(p["w_clip"].shape), full(p["b_clip"].shape),
                  full(p["w_cc_tail"].shape), full(p["b_cc"].shape),
                  full(p["w_ctx"].shape), full(p["b_ctx"].shape)],
        out_specs=full((N, C)),
    )(pooled, psel, p["null_prompt"], deltac, p["w_clip"], p["b_clip"],
      p["w_cc_tail"], p["b_cc"], p["w_ctx"], p["b_ctx"])


def pallas_fused_diffusion(scal, x3, nz3, xc3, wa, wb, ctxb3, th):
    """Fused: q_sample + CFG input mask + 1x1-conv UNet surrogate + ctx bias +
    per-sample L2 reduction.

    Grid = (N, HW tiles): batch is 'parallel' (megacore can shard it), the HW
    axis is an 'arbitrary' reduction with the (1,1) per-sample output block
    resident as an accumulator.  Per-sample scalar coefficients live in one
    (N, 3) SMEM table; big operands are lane-dense (C, th) tiles; UNet weights
    are resident bf16 blocks (index_map constant along the grid)."""
    N, C, HW = x3.shape
    nhw = HW // th
    inv_chw = 1.0 / (C * HW)

    def kernel(scal_ref, xt_ref, nz_ref, xc_ref, wa_ref, wb_ref, ctxb_ref, per_ref):
        b = pl.program_id(0)
        h = pl.program_id(1)
        ca = scal_ref[b, 0]          # sqrt(acp[t]) * scale_factor
        cb = scal_ref[b, 1]          # sqrt(1 - acp[t])
        im = scal_ref[b, 2]          # CFG input mask in {0,1}

        @pl.when(h == 0)
        def _():
            per_ref[...] = jnp.zeros_like(per_ref)

        x = xt_ref[...]                                           # (C, th)
        nz = nz_ref[...]                                          # (C, th)
        # q_sample (scale_factor already folded into ca in the wrapper)
        perturbed = ca * x + cb * nz
        cond = im * xc_ref[...]                                   # CFG input mask
        # channel-concat 1x1 conv in channel-major (lane-dense HW) form:
        #   est = W[:, :C] @ perturbed + W[:, C:] @ cond + ctx_bias
        # bf16 MXU operands, f32 accumulation; elementwise/reduction stays f32.
        est = (jnp.dot(wa_ref[...], perturbed.astype(jnp.bfloat16),
                       preferred_element_type=jnp.float32)
               + jnp.dot(wb_ref[...], cond.astype(jnp.bfloat16),
                         preferred_element_type=jnp.float32)
               + ctxb_ref[...])                                   # (C,1) bcast over th
        diff = est - nz
        per_ref[...] += jnp.sum(jnp.sum(diff * diff, axis=1, keepdims=True),
                                axis=0, keepdims=True)

        @pl.when(h == pl.num_programs(1) - 1)
        def _():
            per_ref[...] *= inv_chw          # per-sample mean over (C, H, W)

    def samp_spec():
        return pl.BlockSpec((None, C, th), lambda b, h: (b, 0, h))

    return pl.pallas_call(
        kernel,
        out_shape=jax.ShapeDtypeStruct((N, 1, 1), jnp.float32),
        grid=(N, nhw),
        in_specs=[pl.BlockSpec(memory_space=pltpu.MemorySpace.SMEM),   # (N,3) scalars
                  samp_spec(), samp_spec(), samp_spec(),
                  pl.BlockSpec((C, C), lambda b, h: (0, 0)),
                  pl.BlockSpec((C, C), lambda b, h: (0, 0)),
                  pl.BlockSpec((None, C, 1), lambda b, h: (b, 0, 0))],
        out_specs=pl.BlockSpec((None, 1, 1), lambda b, h: (b, 0, 0)),
        compiler_params=pltpu.CompilerParams(
            dimension_semantics=("parallel", "arbitrary"),   # batch || , HW reduce
            vmem_limit_bytes=32 * 1024 * 1024),
    )(scal, x3, nz3, xc3, wa, wb, ctxb3)


# -------------------------------- forward pass --------------------------------
def ddpm_forward(x_target, x_cond, deltac, key):
    """x_target, x_cond: (N, C, H, W) latents (float32); deltac: (N, 2)."""
    N, C, H, W = x_target.shape
    HW = H * W
    th = pick_hw_tile(HW)
    params = make_params(C)
    sqrt_acp, sqrt_1m_acp, lvlb_weights = make_schedule()

    kt, kn, kr = jax.random.split(key, 3)
    t = jax.random.randint(kt, (N,), 0, NUM_TIMESTEPS)
    noise = jax.random.normal(kn, (N, C, H, W), jnp.float32)
    rand_u = jax.random.uniform(kr, (N,), jnp.float32)

    # NCHW -> (N, C, HW): contiguous reshape, no transpose / layout shuffle.
    x3 = x_target.reshape(N, C, HW)
    nz3 = noise.reshape(N, C, HW)
    xc3 = x_cond.reshape(N, C, HW)

    # "very first" scale_factor = 1/std(z) (LDM first-batch convention; the
    # autoencoder is bypassed, see TODO) — streaming Pallas reduction.
    scale = pallas_inv_std(x3, th)[0, 0]

    # per-sample scalar table consumed from SMEM by the fused kernel
    coef_a = sqrt_acp[t] * scale                          # sqrt(acp[t]) * scale
    coef_b = sqrt_1m_acp[t]                               # sqrt(1 - acp[t])
    input_mask = 1.0 - ((rand_u >= UNCOND) & (rand_u < 3 * UNCOND)).astype(jnp.float32)
    scal = jnp.stack([coef_a, coef_b, input_mask], axis=1)        # (N, 3)
    prompt_sel = (rand_u < 2 * UNCOND).astype(jnp.float32).reshape(N, 1)

    # fused conditioning path: CLIP surrogate -> CFG select -> cc_projection
    # (identity + rank-2 deltac update) -> context->channel bias.  (N, C)
    pooled_cond = jnp.mean(xc3, axis=2)                   # (N, C) tiny glue
    ctx_bias = pallas_conditioning(pooled_cond, prompt_sel, deltac, params)
    ctx_bias3 = ctx_bias.reshape(N, C, 1)                 # bias per output channel

    # fused q_sample + mask + UNet surrogate + per-sample L2
    per = pallas_fused_diffusion(scal, x3, nz3, xc3,
                                 params["w_unet_a"], params["w_unet_b"],
                                 ctx_bias3, th).reshape(N)        # (N,)

    # loss = l_simple_weight * mean_b(per) + elbo_weight * mean_b(lvlb[t_b]*per)
    lvlb_t = lvlb_weights[t]
    loss = per.mean() * L_SIMPLE_WEIGHT + ORIGINAL_ELBO_WEIGHT * (lvlb_t * per).mean()
    return loss


if __name__ == "__main__":
    key = jax.random.PRNGKey(0)
    k0, k1, k2, k3 = jax.random.split(key, 4)
    N, C, H, W = 2, 4, 16, 16            # small latent shapes for the demo
    x_target = jax.random.normal(k0, (N, C, H, W), jnp.float32)
    x_cond = jax.random.normal(k1, (N, C, H, W), jnp.float32)
    deltac = jax.random.normal(k2, (N, DELTAC_DIM), jnp.float32)

    fwd = jax.jit(ddpm_forward)
    loss = fwd(x_target, x_cond, deltac, k3)
    jax.block_until_ready(loss)
    assert loss.shape == () and bool(jnp.isfinite(loss))
    print("KERNEL_OK")
</pallas_src>

<mosaic_0001>
module attributes {stable_mosaic.version = 11 : i64} {
  func.func @kernel(%arg0: i32, %arg1: i32, %arg2: memref<1x4x256xf32, #tpu.memory_space<vmem>>, %arg3: memref<1x1xf32, #tpu.memory_space<vmem>>, %arg4: memref<1x1xf32, #tpu.memory_space<vmem>>, %arg5: memref<1x1xf32, #tpu.memory_space<vmem>>) attributes {dimension_semantics = [#tpu.dimension_semantics<arbitrary>, #tpu.dimension_semantics<arbitrary>], iteration_bounds = array<i64: 2, 1>, scalar_prefetch = 0 : i64, scratch_operands = 2 : i64, tpu.core_type = #tpu.core_type<tc>, window_params = [{transform_indices = @transform_0, window_bounds = array<i64: 1, 4, 256>}, {pipeline_mode = #tpu.pipeline_mode<synchronous>, transform_indices = @transform_1, window_bounds = array<i64: 1, 1>}]} {
    %c0_i32 = arith.constant 0 : i32
    %0 = arith.cmpi eq, %arg0, %c0_i32 : i32
    %c0_i32_0 = arith.constant 0 : i32
    %1 = arith.cmpi eq, %arg1, %c0_i32_0 : i32
    %2 = arith.andi %0, %1 : i1
    %3 = arith.extui %2 : i1 to i32
    %c0_i32_1 = arith.constant 0 : i32
    %4 = arith.cmpi ne, %3, %c0_i32_1 : i32
    scf.if %4 {
      %cst_17 = arith.constant 0.000000e+00 : f32
      %27 = vector.broadcast %cst_17 : f32 to vector<1x1xf32>
      %c0_18 = arith.constant 0 : index
      %c0_19 = arith.constant 0 : index
      %28 = vector.load %arg4[%c0_18, %c0_19] : memref<1x1xf32, #tpu.memory_space<vmem>>, vector<1x1xf32>
      tpu.vector_store %arg4[%c0_18, %c0_19], %27 {strides = array<i32>} : memref<1x1xf32, #tpu.memory_space<vmem>>, vector<1x1xf32>,
      %cst_20 = arith.constant 0.000000e+00 : f32
      %29 = vector.broadcast %cst_20 : f32 to vector<1x1xf32>
      %c0_21 = arith.constant 0 : index
      %c0_22 = arith.constant 0 : index
      %30 = vector.load %arg5[%c0_21, %c0_22] : memref<1x1xf32, #tpu.memory_space<vmem>>, vector<1x1xf32>
      tpu.vector_store %arg5[%c0_21, %c0_22], %29 {strides = array<i32>} : memref<1x1xf32, #tpu.memory_space<vmem>>, vector<1x1xf32>,
    } else {
    }
    %c0 = arith.constant 0 : index
    %c0_2 = arith.constant 0 : index
    %c0_3 = arith.constant 0 : index
    %5 = vector.load %arg2[%c0, %c0_2, %c0_3] : memref<1x4x256xf32, #tpu.memory_space<vmem>>, vector<1x4x256xf32>
    %6 = vector.shape_cast %5 : vector<1x4x256xf32> to vector<4x256xf32>
    %c0_4 = arith.constant 0 : index
    %c0_5 = arith.constant 0 : index
    %7 = vector.load %arg4[%c0_4, %c0_5] : memref<1x1xf32, #tpu.memory_space<vmem>>, vector<1x1xf32>
    %cst = arith.constant dense<0.000000e+00> : vector<4xf32>
    %8 = vector.multi_reduction <add>, %6, %cst [1] : vector<4x256xf32> to vector<4xf32>
    %9 = vector.shape_cast %8 : vector<4xf32> to vector<4x1xf32>
    %cst_6 = arith.constant dense<0.000000e+00> : vector<1xf32>
    %10 = vector.multi_reduction <add>, %9, %cst_6 [0] : vector<4x1xf32> to vector<1xf32>
    %11 = vector.shape_cast %10 : vector<1xf32> to vector<1x1xf32>
    %12 = arith.addf %7, %11 : vector<1x1xf32>
    %c0_7 = arith.constant 0 : index
    %c0_8 = arith.constant 0 : index
    %13 = vector.load %arg4[%c0_7, %c0_8] : memref<1x1xf32, #tpu.memory_space<vmem>>, vector<1x1xf32>
    tpu.vector_store %arg4[%c0_7, %c0_8], %12 {strides = array<i32>} : memref<1x1xf32, #tpu.memory_space<vmem>>, vector<1x1xf32>,
    %c0_9 = arith.constant 0 : index
    %c0_10 = arith.constant 0 : index
    %14 = vector.load %arg5[%c0_9, %c0_10] : memref<1x1xf32, #tpu.memory_space<vmem>>, vector<1x1xf32>
    %15 = arith.mulf %6, %6 : vector<4x256xf32>
    %cst_11 = arith.constant dense<0.000000e+00> : vector<4xf32>
    %16 = vector.multi_reduction <add>, %15, %cst_11 [1] : vector<4x256xf32> to vector<4xf32>
    %17 = vector.shape_cast %16 : vector<4xf32> to vector<4x1xf32>
    %cst_12 = arith.constant dense<0.000000e+00> : vector<1xf32>
    %18 = vector.multi_reduction <add>, %17, %cst_12 [0] : vector<4x1xf32> to vector<1xf32>
    %19 = vector.shape_cast %18 : vector<1xf32> to vector<1x1xf32>
    %20 = arith.addf %14, %19 : vector<1x1xf32>
    %c0_13 = arith.constant 0 : index
    %c0_14 = arith.constant 0 : index
    %21 = vector.load %arg5[%c0_13, %c0_14] : memref<1x1xf32, #tpu.memory_space<vmem>>, vector<1x1xf32>
    tpu.vector_store %arg5[%c0_13, %c0_14], %20 {strides = array<i32>} : memref<1x1xf32, #tpu.memory_space<vmem>>, vector<1x1xf32>,
    %c1_i32 = arith.constant 1 : i32
    %22 = arith.cmpi eq, %arg0, %c1_i32 : i32
    %c0_i32_15 = arith.constant 0 : i32
    %23 = arith.cmpi eq, %arg1, %c0_i32_15 : i32
    %24 = arith.andi %22, %23 : i1
    %25 = arith.extui %24 : i1 to i32
    %c0_i32_16 = arith.constant 0 : i32
    %26 = arith.cmpi ne, %25, %c0_i32_16 : i32
    scf.if %26 {
      %c0_17 = arith.constant 0 : index
      %c0_18 = arith.constant 0 : index
      %27 = vector.load %arg4[%c0_17, %c0_18] : memref<1x1xf32, #tpu.memory_space<vmem>>, vector<1x1xf32>
      %c0_19 = arith.constant 0 : index
      %c0_20 = arith.constant 0 : index
      %28 = vector.load %arg5[%c0_19, %c0_20] : memref<1x1xf32, #tpu.memory_space<vmem>>, vector<1x1xf32>
      %29 = arith.mulf %27, %27 : vector<1x1xf32>
      %cst_21 = arith.constant 4.8828125E-4 : f32
      %30 = vector.broadcast %cst_21 : f32 to vector<1x1xf32>
      %31 = arith.mulf %29, %30 : vector<1x1xf32>
      %32 = arith.subf %28, %31 : vector<1x1xf32>
      %cst_22 = arith.constant 4.88519785E-4 : f32
      %33 = vector.broadcast %cst_22 : f32 to vector<1x1xf32>
      %34 = arith.mulf %32, %33 : vector<1x1xf32>
      %35 = math.rsqrt %34 : vector<1x1xf32>
      %c0_23 = arith.constant 0 : index
      %c0_24 = arith.constant 0 : index
      %36 = vector.load %arg3[%c0_23, %c0_24] : memref<1x1xf32, #tpu.memory_space<vmem>>, vector<1x1xf32>
      tpu.vector_store %arg3[%c0_23, %c0_24], %35 {strides = array<i32>} : memref<1x1xf32, #tpu.memory_space<vmem>>, vector<1x1xf32>,
    } else {
    }
    return
  }
  func.func @transform_0(%arg0: i32, %arg1: i32) -> (i32, i32, i32) {
    %c0_i32 = arith.constant 0 : i32
    %c0_i32_0 = arith.constant 0 : i32
    return %arg0, %c0_i32, %arg1 : i32, i32, i32
  }
  func.func @transform_1(%arg0: i32, %arg1: i32) -> (i32, i32) {
    %c0_i32 = arith.constant 0 : i32
    %c0_i32_0 = arith.constant 0 : i32
    %c0_i32_1 = arith.constant 0 : i32
    return %c0_i32, %c0_i32_0 : i32, i32
  }
}

module attributes {stable_mosaic.version = 11 : i64} {
  func.func @cond_kernel(%arg0: i32, %arg1: memref<2x4xf32, #tpu.memory_space<vmem>>, %arg2: memref<2x1xf32, #tpu.memory_space<vmem>>, %arg3: memref<1x768xf32, #tpu.memory_space<vmem>>, %arg4: memref<2x2xf32, #tpu.memory_space<vmem>>, %arg5: memref<4x768xf32, #tpu.memory_space<vmem>>, %arg6: memref<1x768xf32, #tpu.memory_space<vmem>>, %arg7: memref<2x768xf32, #tpu.memory_space<vmem>>, %arg8: memref<1x768xf32, #tpu.memory_space<vmem>>, %arg9: memref<768x4xf32, #tpu.memory_space<vmem>>, %arg10: memref<1x4xf32, #tpu.memory_space<vmem>>, %arg11: memref<2x4xf32, #tpu.memory_space<vmem>>) attributes {dimension_semantics = [#tpu.dimension_semantics<arbitrary>], iteration_bounds = array<i64: 1>, scalar_prefetch = 0 : i64, scratch_operands = 0 : i64, tpu.core_type = #tpu.core_type<tc>, window_params = [{pipeline_mode = #tpu.pipeline_mode<synchronous>, transform_indices = @transform_0, window_bounds = array<i64: 2, 4>}, {pipeline_mode = #tpu.pipeline_mode<synchronous>, transform_indices = @transform_1, window_bounds = array<i64: 2, 1>}, {pipeline_mode = #tpu.pipeline_mode<synchronous>, transform_indices = @transform_2, window_bounds = array<i64: 1, 768>}, {pipeline_mode = #tpu.pipeline_mode<synchronous>, transform_indices = @transform_3, window_bounds = array<i64: 2, 2>}, {pipeline_mode = #tpu.pipeline_mode<synchronous>, transform_indices = @transform_4, window_bounds = array<i64: 4, 768>}, {pipeline_mode = #tpu.pipeline_mode<synchronous>, transform_indices = @transform_5, window_bounds = array<i64: 1, 768>}, {pipeline_mode = #tpu.pipeline_mode<synchronous>, transform_indices = @transform_6, window_bounds = array<i64: 2, 768>}, {pipeline_mode = #tpu.pipeline_mode<synchronous>, transform_indices = @transform_7, window_bounds = array<i64: 1, 768>}, {pipeline_mode = #tpu.pipeline_mode<synchronous>, transform_indices = @transform_8, window_bounds = array<i64: 768, 4>}, {pipeline_mode = #tpu.pipeline_mode<synchronous>, transform_indices = @transform_9, window_bounds = array<i64: 1, 4>}, {pipeline_mode = #tpu.pipeline_mode<synchronous>, transform_indices = @transform_10, window_bounds = array<i64: 2, 4>}]} {
    %c0 = arith.constant 0 : index
    %c0_0 = arith.constant 0 : index
    %0 = vector.load %arg1[%c0, %c0_0] : memref<2x4xf32, #tpu.memory_space<vmem>>, vector<2x4xf32>
    %c0_1 = arith.constant 0 : index
    %c0_2 = arith.constant 0 : index
    %1 = vector.load %arg5[%c0_1, %c0_2] : memref<4x768xf32, #tpu.memory_space<vmem>>, vector<4x768xf32>
    %cst = arith.constant dense<0.000000e+00> : vector<2x768xf32>
    %2 = tpu.matmul %0, %1, %cst {dimension_numbers = #tpu.dot_dimension_numbers<[1], [0], [0], [1], [0, 0, 1, 1], [], []>} : vector<2x4xf32>, vector<4x768xf32>, vector<2x768xf32> -> vector<2x768xf32>
    %c0_3 = arith.constant 0 : index
    %c0_4 = arith.constant 0 : index
    %3 = vector.load %arg6[%c0_3, %c0_4] : memref<1x768xf32, #tpu.memory_space<vmem>>, vector<1x768xf32>
    %4 = vector.broadcast %3 : vector<1x768xf32> to vector<2x768xf32>
    %5 = arith.addf %2, %4 : vector<2x768xf32>
    %c0_5 = arith.constant 0 : index
    %c0_6 = arith.constant 0 : index
    %6 = vector.load %arg2[%c0_5, %c0_6] : memref<2x1xf32, #tpu.memory_space<vmem>>, vector<2x1xf32>
    %c0_7 = arith.constant 0 : index
    %c0_8 = arith.constant 0 : index
    %7 = vector.load %arg3[%c0_7, %c0_8] : memref<1x768xf32, #tpu.memory_space<vmem>>, vector<1x768xf32>
    %8 = vector.broadcast %6 : vector<2x1xf32> to vector<2x768xf32>
    %9 = vector.broadcast %7 : vector<1x768xf32> to vector<2x768xf32>
    %10 = arith.mulf %8, %9 : vector<2x768xf32>
    %cst_9 = arith.constant 1.000000e+00 : f32
    %11 = vector.broadcast %cst_9 : f32 to vector<2x1xf32>
    %12 = arith.subf %11, %6 : vector<2x1xf32>
    %13 = vector.broadcast %12 : vector<2x1xf32> to vector<2x768xf32>
    %14 = arith.mulf %13, %5 : vector<2x768xf32>
    %15 = arith.addf %10, %14 : vector<2x768xf32>
    %c0_10 = arith.constant 0 : index
    %c0_11 = arith.constant 0 : index
    %16 = vector.load %arg4[%c0_10, %c0_11] : memref<2x2xf32, #tpu.memory_space<vmem>>, vector<2x2xf32>
    %c0_12 = arith.constant 0 : index
    %c0_13 = arith.constant 0 : index
    %17 = vector.load %arg7[%c0_12, %c0_13] : memref<2x768xf32, #tpu.memory_space<vmem>>, vector<2x768xf32>
    %cst_14 = arith.constant dense<0.000000e+00> : vector<2x768xf32>
    %18 = tpu.matmul %16, %17, %cst_14 {dimension_numbers = #tpu.dot_dimension_numbers<[1], [0], [0], [1], [0, 0, 1, 1], [], []>} : vector<2x2xf32>, vector<2x768xf32>, vector<2x768xf32> -> vector<2x768xf32>
    %19 = arith.addf %15, %18 : vector<2x768xf32>
    %c0_15 = arith.constant 0 : index
    %c0_16 = arith.constant 0 : index
    %20 = vector.load %arg8[%c0_15, %c0_16] : memref<1x768xf32, #tpu.memory_space<vmem>>, vector<1x768xf32>
    %21 = vector.broadcast %20 : vector<1x768xf32> to vector<2x768xf32>
    %22 = arith.addf %19, %21 : vector<2x768xf32>
    %c0_17 = arith.constant 0 : index
    %c0_18 = arith.constant 0 : index
    %23 = vector.load %arg9[%c0_17, %c0_18] : memref<768x4xf32, #tpu.memory_space<vmem>>, vector<768x4xf32>
    %cst_19 = arith.constant dense<0.000000e+00> : vector<2x4xf32>
    %24 = tpu.matmul %22, %23, %cst_19 {dimension_numbers = #tpu.dot_dimension_numbers<[1], [0], [0], [1], [0, 0, 1, 1], [], []>} : vector<2x768xf32>, vector<768x4xf32>, vector<2x4xf32> -> vector<2x4xf32>
    %c0_20 = arith.constant 0 : index
    %c0_21 = arith.constant 0 : index
    %25 = vector.load %arg10[%c0_20, %c0_21] : memref<1x4xf32, #tpu.memory_space<vmem>>, vector<1x4xf32>
    %26 = vector.broadcast %25 : vector<1x4xf32> to vector<2x4xf32>
    %27 = arith.addf %24, %26 : vector<2x4xf32>
    %c0_22 = arith.constant 0 : index
    %c0_23 = arith.constant 0 : index
    %28 = vector.load %arg11[%c0_22, %c0_23] : memref<2x4xf32, #tpu.memory_space<vmem>>, vector<2x4xf32>
    tpu.vector_store %arg11[%c0_22, %c0_23], %27 {strides = array<i32>} : memref<2x4xf32, #tpu.memory_space<vmem>>, vector<2x4xf32>,
    return
  }
  func.func @transform_0(%arg0: i32) -> (i32, i32) {
    %c0_i32 = arith.constant 0 : i32
    %c0_i32_0 = arith.constant 0 : i32
    %c0_i32_1 = arith.constant 0 : i32
    return %c0_i32, %c0_i32_0 : i32, i32
  }
  func.func @transform_1(%arg0: i32) -> (i32, i32) {
    %c0_i32 = arith.constant 0 : i32
    %c0_i32_0 = arith.constant 0 : i32
    %c0_i32_1 = arith.constant 0 : i32
    return %c0_i32, %c0_i32_0 : i32, i32
  }
  func.func @transform_2(%arg0: i32) -> (i32, i32) {
    %c0_i32 = arith.constant 0 : i32
    %c0_i32_0 = arith.constant 0 : i32
    %c0_i32_1 = arith.constant 0 : i32
    return %c0_i32, %c0_i32_0 : i32, i32
  }
  func.func @transform_3(%arg0: i32) -> (i32, i32) {
    %c0_i32 = arith.constant 0 : i32
    %c0_i32_0 = arith.constant 0 : i32
    %c0_i32_1 = arith.constant 0 : i32
    return %c0_i32, %c0_i32_0 : i32, i32
  }
  func.func @transform_4(%arg0: i32) -> (i32, i32) {
    %c0_i32 = arith.constant 0 : i32
    %c0_i32_0 = arith.constant 0 : i32
    %c0_i32_1 = arith.constant 0 : i32
    return %c0_i32, %c0_i32_0 : i32, i32
  }
  func.func @transform_5(%arg0: i32) -> (i32, i32) {
    %c0_i32 = arith.constant 0 : i32
    %c0_i32_0 = arith.constant 0 : i32
    %c0_i32_1 = arith.constant 0 : i32
    return %c0_i32, %c0_i32_0 : i32, i32
  }
  func.func @transform_6(%arg0: i32) -> (i32, i32) {
    %c0_i32 = arith.constant 0 : i32
    %c0_i32_0 = arith.constant 0 : i32
    %c0_i32_1 = arith.constant 0 : i32
    return %c0_i32, %c0_i32_0 : i32, i32
  }
  func.func @transform_7(%arg0: i32) -> (i32, i32) {
    %c0_i32 = arith.constant 0 : i32
    %c0_i32_0 = arith.constant 0 : i32
    %c0_i32_1 = arith.constant 0 : i32
    return %c0_i32, %c0_i32_0 : i32, i32
  }
  func.func @transform_8(%arg0: i32) -> (i32, i32) {
    %c0_i32 = arith.constant 0 : i32
    %c0_i32_0 = arith.constant 0 : i32
    %c0_i32_1 = arith.constant 0 : i32
    return %c0_i32, %c0_i32_0 : i32, i32
  }
  func.func @transform_9(%arg0: i32) -> (i32, i32) {
    %c0_i32 = arith.constant 0 : i32
    %c0_i32_0 = arith.constant 0 : i32
    %c0_i32_1 = arith.constant 0 : i32
    return %c0_i32, %c0_i32_0 : i32, i32
  }
  func.func @transform_10(%arg0: i32) -> (i32, i32) {
    %c0_i32 = arith.constant 0 : i32
    %c0_i32_0 = arith.constant 0 : i32
    %c0_i32_1 = arith.constant 0 : i32
    return %c0_i32, %c0_i32_0 : i32, i32
  }
}

module attributes {stable_mosaic.version = 11 : i64} {
  func.func @kernel(%arg0: i32, %arg1: i32, %arg2: memref<2x3xf32, #tpu.memory_space<smem>>, %arg3: memref<1x4x256xf32, #tpu.memory_space<vmem>>, %arg4: memref<1x4x256xf32, #tpu.memory_space<vmem>>, %arg5: memref<1x4x256xf32, #tpu.memory_space<vmem>>, %arg6: memref<4x4xbf16, #tpu.memory_space<vmem>>, %arg7: memref<4x4xbf16, #tpu.memory_space<vmem>>, %arg8: memref<1x4x1xf32, #tpu.memory_space<vmem>>, %arg9: memref<1x1x1xf32, #tpu.memory_space<vmem>>) attributes {dimension_semantics = [#tpu.dimension_semantics<parallel>, #tpu.dimension_semantics<arbitrary>], iteration_bounds = array<i64: 2, 1>, scalar_prefetch = 0 : i64, scratch_operands = 0 : i64, tpu.core_type = #tpu.core_type<tc>, window_params = [{transform_indices = @transform_0, window_bounds = array<i64: 2, 3>}, {transform_indices = @transform_1, window_bounds = array<i64: 1, 4, 256>}, {transform_indices = @transform_2, window_bounds = array<i64: 1, 4, 256>}, {transform_indices = @transform_3, window_bounds = array<i64: 1, 4, 256>}, {pipeline_mode = #tpu.pipeline_mode<synchronous>, transform_indices = @transform_4, window_bounds = array<i64: 4, 4>}, {pipeline_mode = #tpu.pipeline_mode<synchronous>, transform_indices = @transform_5, window_bounds = array<i64: 4, 4>}, {transform_indices = @transform_6, window_bounds = array<i64: 1, 4, 1>}, {transform_indices = @transform_7, window_bounds = array<i64: 1, 1, 1>}]} {
    %0 = arith.index_cast %arg0 : i32 to index
    %c0 = arith.constant 0 : index
    %1 = memref.load %arg2[%0, %c0] : memref<2x3xf32, #tpu.memory_space<smem>>
    %2 = arith.index_cast %arg0 : i32 to index
    %c1 = arith.constant 1 : index
    %3 = memref.load %arg2[%2, %c1] : memref<2x3xf32, #tpu.memory_space<smem>>
    %4 = arith.index_cast %arg0 : i32 to index
    %c2 = arith.constant 2 : index
    %5 = memref.load %arg2[%4, %c2] : memref<2x3xf32, #tpu.memory_space<smem>>
    %c0_i32 = arith.constant 0 : i32
    %6 = arith.cmpi eq, %arg1, %c0_i32 : i32
    %7 = arith.extui %6 : i1 to i32
    %c0_i32_0 = arith.constant 0 : i32
    %8 = arith.cmpi ne, %7, %c0_i32_0 : i32
    scf.if %8 {
      %cst_28 = arith.constant 0.000000e+00 : f32
      %48 = vector.broadcast %cst_28 : f32 to vector<1x1xf32>
      %c0_29 = arith.constant 0 : index
      %c0_30 = arith.constant 0 : index
      %c0_31 = arith.constant 0 : index
      %49 = vector.load %arg9[%c0_29, %c0_30, %c0_31] : memref<1x1x1xf32, #tpu.memory_space<vmem>>, vector<1x1x1xf32>
      %50 = vector.shape_cast %49 : vector<1x1x1xf32> to vector<1x1xf32>
      %51 = vector.shape_cast %48 : vector<1x1xf32> to vector<1x1x1xf32>
      tpu.vector_store %arg9[%c0_29, %c0_30, %c0_31], %51 {strides = array<i32>} : memref<1x1x1xf32, #tpu.memory_space<vmem>>, vector<1x1x1xf32>,
    } else {
    }
    %c0_1 = arith.constant 0 : index
    %c0_2 = arith.constant 0 : index
    %c0_3 = arith.constant 0 : index
    %9 = vector.load %arg3[%c0_1, %c0_2, %c0_3] : memref<1x4x256xf32, #tpu.memory_space<vmem>>, vector<1x4x256xf32>
    %10 = vector.shape_cast %9 : vector<1x4x256xf32> to vector<4x256xf32>
    %c0_4 = arith.constant 0 : index
    %c0_5 = arith.constant 0 : index
    %c0_6 = arith.constant 0 : index
    %11 = vector.load %arg4[%c0_4, %c0_5, %c0_6] : memref<1x4x256xf32, #tpu.memory_space<vmem>>, vector<1x4x256xf32>
    %12 = vector.shape_cast %11 : vector<1x4x256xf32> to vector<4x256xf32>
    %13 = vector.broadcast %1 : f32 to vector<4x256xf32>
    %14 = arith.mulf %13, %10 : vector<4x256xf32>
    %15 = vector.broadcast %3 : f32 to vector<4x256xf32>
    %16 = arith.mulf %15, %12 : vector<4x256xf32>
    %17 = arith.addf %14, %16 : vector<4x256xf32>
    %c0_7 = arith.constant 0 : index
    %c0_8 = arith.constant 0 : index
    %c0_9 = arith.constant 0 : index
    %18 = vector.load %arg5[%c0_7, %c0_8, %c0_9] : memref<1x4x256xf32, #tpu.memory_space<vmem>>, vector<1x4x256xf32>
    %19 = vector.shape_cast %18 : vector<1x4x256xf32> to vector<4x256xf32>
    %20 = vector.broadcast %5 : f32 to vector<4x256xf32>
    %21 = arith.mulf %20, %19 : vector<4x256xf32>
    %c0_10 = arith.constant 0 : index
    %c0_11 = arith.constant 0 : index
    %22 = vector.load %arg6[%c0_10, %c0_11] : memref<4x4xbf16, #tpu.memory_space<vmem>>, vector<4x4xbf16>
    %23 = arith.truncf %17 : vector<4x256xf32> to vector<4x256xbf16>
    %cst = arith.constant dense<0.000000e+00> : vector<4x256xf32>
    %24 = tpu.matmul %22, %23, %cst {dimension_numbers = #tpu.dot_dimension_numbers<[1], [0], [0], [1], [0, 0, 1, 1], [], []>} : vector<4x4xbf16>, vector<4x256xbf16>, vector<4x256xf32> -> vector<4x256xf32>
    %c0_12 = arith.constant 0 : index
    %c0_13 = arith.constant 0 : index
    %25 = vector.load %arg7[%c0_12, %c0_13] : memref<4x4xbf16, #tpu.memory_space<vmem>>, vector<4x4xbf16>
    %26 = arith.truncf %21 : vector<4x256xf32> to vector<4x256xbf16>
    %cst_14 = arith.constant dense<0.000000e+00> : vector<4x256xf32>
    %27 = tpu.matmul %25, %26, %cst_14 {dimension_numbers = #tpu.dot_dimension_numbers<[1], [0], [0], [1], [0, 0, 1, 1], [], []>} : vector<4x4xbf16>, vector<4x256xbf16>, vector<4x256xf32> -> vector<4x256xf32>
    %28 = arith.addf %24, %27 : vector<4x256xf32>
    %c0_15 = arith.constant 0 : index
    %c0_16 = arith.constant 0 : index
    %c0_17 = arith.constant 0 : index
    %29 = vector.load %arg8[%c0_15, %c0_16, %c0_17] : memref<1x4x1xf32, #tpu.memory_space<vmem>>, vector<1x4x1xf32>
    %30 = vector.shape_cast %29 : vector<1x4x1xf32> to vector<4x1xf32>
    %31 = vector.broadcast %30 : vector<4x1xf32> to vector<4x256xf32>
    %32 = arith.addf %28, %31 : vector<4x256xf32>
    %33 = arith.subf %32, %12 : vector<4x256xf32>
    %c0_18 = arith.constant 0 : index
    %c0_19 = arith.constant 0 : index
    %c0_20 = arith.constant 0 : index
    %34 = vector.load %arg9[%c0_18, %c0_19, %c0_20] : memref<1x1x1xf32, #tpu.memory_space<vmem>>, vector<1x1x1xf32>
    %35 = vector.shape_cast %34 : vector<1x1x1xf32> to vector<1x1xf32>
    %36 = arith.mulf %33, %33 : vector<4x256xf32>
    %cst_21 = arith.constant dense<0.000000e+00> : vector<4xf32>
    %37 = vector.multi_reduction <add>, %36, %cst_21 [1] : vector<4x256xf32> to vector<4xf32>
    %38 = vector.shape_cast %37 : vector<4xf32> to vector<4x1xf32>
    %cst_22 = arith.constant dense<0.000000e+00> : vector<1xf32>
    %39 = vector.multi_reduction <add>, %38, %cst_22 [0] : vector<4x1xf32> to vector<1xf32>
    %40 = vector.shape_cast %39 : vector<1xf32> to vector<1x1xf32>
    %41 = arith.addf %35, %40 : vector<1x1xf32>
    %c0_23 = arith.constant 0 : index
    %c0_24 = arith.constant 0 : index
    %c0_25 = arith.constant 0 : index
    %42 = vector.load %arg9[%c0_23, %c0_24, %c0_25] : memref<1x1x1xf32, #tpu.memory_space<vmem>>, vector<1x1x1xf32>
    %43 = vector.shape_cast %42 : vector<1x1x1xf32> to vector<1x1xf32>
    %44 = vector.shape_cast %41 : vector<1x1xf32> to vector<1x1x1xf32>
    tpu.vector_store %arg9[%c0_23, %c0_24, %c0_25], %44 {strides = array<i32>} : memref<1x1x1xf32, #tpu.memory_space<vmem>>, vector<1x1x1xf32>,
    %c0_i32_26 = arith.constant 0 : i32
    %45 = arith.cmpi eq, %arg1, %c0_i32_26 : i32
    %46 = arith.extui %45 : i1 to i32
    %c0_i32_27 = arith.constant 0 : i32
    %47 = arith.cmpi ne, %46, %c0_i32_27 : i32
    scf.if %47 {
      %c0_28 = arith.constant 0 : index
      %c0_29 = arith.constant 0 : index
      %c0_30 = arith.constant 0 : index
      %48 = vector.load %arg9[%c0_28, %c0_29, %c0_30] : memref<1x1x1xf32, #tpu.memory_space<vmem>>, vector<1x1x1xf32>
      %49 = vector.shape_cast %48 : vector<1x1x1xf32> to vector<1x1xf32>
      %cst_31 = arith.constant 9.765625E-4 : f32
      %50 = vector.broadcast %cst_31 : f32 to vector<1x1xf32>
      %51 = arith.mulf %49, %50 : vector<1x1xf32>
      %c0_32 = arith.constant 0 : index
      %c0_33 = arith.constant 0 : index
      %c0_34 = arith.constant 0 : index
      %52 = vector.load %arg9[%c0_32, %c0_33, %c0_34] : memref<1x1x1xf32, #tpu.memory_space<vmem>>, vector<1x1x1xf32>
      %53 = vector.shape_cast %52 : vector<1x1x1xf32> to vector<1x1xf32>
      %54 = vector.shape_cast %51 : vector<1x1xf32> to vector<1x1x1xf32>
      tpu.vector_store %arg9[%c0_32, %c0_33, %c0_34], %54 {strides = array<i32>} : memref<1x1x1xf32, #tpu.memory_space<vmem>>, vector<1x1x1xf32>,
    } else {
    }
    return
  }
  func.func @transform_0(%arg0: i32, %arg1: i32) -> (i32, i32) {
    %c0_i32 = arith.constant 0 : i32
    %c0_i32_0 = arith.constant 0 : i32
    %c0_i32_1 = arith.constant 0 : i32
    return %c0_i32, %c0_i32_0 : i32, i32
  }
  func.func @transform_1(%arg0: i32, %arg1: i32) -> (i32, i32, i32) {
    %c0_i32 = arith.constant 0 : i32
    %c0_i32_0 = arith.constant 0 : i32
    return %arg0, %c0_i32, %arg1 : i32, i32, i32
  }
  func.func @transform_2(%arg0: i32, %arg1: i32) -> (i32, i32, i32) {
    %c0_i32 = arith.constant 0 : i32
    %c0_i32_0 = arith.constant 0 : i32
    return %arg0, %c0_i32, %arg1 : i32, i32, i32
  }
  func.func @transform_3(%arg0: i32, %arg1: i32) -> (i32, i32, i32) {
    %c0_i32 = arith.constant 0 : i32
    %c0_i32_0 = arith.constant 0 : i32
    return %arg0, %c0_i32, %arg1 : i32, i32, i32
  }
  func.func @transform_4(%arg0: i32, %arg1: i32) -> (i32, i32) {
    %c0_i32 = arith.constant 0 : i32
    %c0_i32_0 = arith.constant 0 : i32
    %c0_i32_1 = arith.constant 0 : i32
    return %c0_i32, %c0_i32_0 : i32, i32
  }
  func.func @transform_5(%arg0: i32, %arg1: i32) -> (i32, i32) {
    %c0_i32 = arith.constant 0 : i32
    %c0_i32_0 = arith.constant 0 : i32
    %c0_i32_1 = arith.constant 0 : i32
    return %c0_i32, %c0_i32_0 : i32, i32
  }
  func.func @transform_6(%arg0: i32, %arg1: i32) -> (i32, i32, i32) {
    %c0_i32 = arith.constant 0 : i32
    %c0_i32_0 = arith.constant 0 : i32
    %c0_i32_1 = arith.constant 0 : i32
    return %arg0, %c0_i32, %c0_i32_0 : i32, i32, i32
  }
  func.func @transform_7(%arg0: i32, %arg1: i32) -> (i32, i32, i32) {
    %c0_i32 = arith.constant 0 : i32
    %c0_i32_0 = arith.constant 0 : i32
    %c0_i32_1 = arith.constant 0 : i32
    return %arg0, %c0_i32, %c0_i32_0 : i32, i32, i32
  }
}

</mosaic_0001>

<bundles_post_ra>
// kernel: ddpm_forward.5
= control target key start
LH: loop header
LB: loop body
LE: loop exit
PB: predicated region body
PF: predicated region fallthrough
CT: control target
= control target key end

     0   :  { %6 = vsyncpa [#allocation5], 0  ;;  %s370_s6 = smov 0   ;;  %s372_s7 = smov 0   ;;  %s446_s0 = inlined_call_operand.vmem [shape: f32[2,4,256], index: 0, kind: input, shape index: {}]   ;;  %s447_s1 = inlined_call_operand.hbm [shape: f32[1,1], index: 1, kind: output, shape index: {}]  }
   0x1   :  { %s374_s8 = smov 0  }
   0x2 LB: > { %s254_s9 = sadd.s32 4294967295, %s356_s8   ;;  %s24_s10 = sadd.s32 1, %s352_s7  ;;  %s356_s8 = sphi %s374_s8, %s12_s8   ;;  %s352_s7 = sphi %s372_s7, %s450_s7   ;;  %s348_s6 = sphi %s370_s6, %s449_s6  }
   0x3   : > { %p26_p0 = scmp.ge.s32.totalorder %s24_s10, 2  ;;  %p257_p1 = scmp.ge.s32.totalorder %s356_s8, 1 }
   0x4   : > { %p102_p2 = scmp.lt.s32.totalorder %s356_s8, 3 }
   0x5   : > { %s452_s10 = smov (%p26_p0, %s24_s10), 0 }
   0x6   : > { %p103_p3 = pnand %p257_p1, %p102_p2 }
   0x7   : > { %p122_p4 = scmp.lt.s32.totalorder (!%p103_p3), %s348_s6, 1  ;;  %p131_p5 = scmp.eq.s32.totalorder (!%p103_p3), %s348_s6, 0 }
   0x8   : > { %106 = sbr.rel (%p103_p3) target bundleno = 239 (0xef), region = 24 }
   0xf   : > { %s123_s11 = scalar_select %p122_p4, %s348_s6, 1 }
  0x10   : > { %136 = sbr.rel (!%p131_p5) target bundleno = 23 (0x17), region = 28  ;;  %vm137_vm0 = vcmask (%p131_p5), 0   ;;  %v358_v0 = vmov (%p131_p5), 0.0  }
  0x11   : > { %s266_s12 = sshll.u32 %s123_s11, 3  ;;  %138 = vst.msk [vmem:[#allocation2] sm:$0x1] (%p131_p5), %vm137_vm0, %v358_v0  ;;  %139 = vst.msk [vmem:[#allocation3] sm:$0x1] (%p131_p5), %vm137_vm0, %v358_v0 }
  0x12   : > { %s129_s15 = scalar_lea.vmem %s446_s0, %s266_s12 }
  0x17 PF: > { %v140_v1 = vld [vmem:[%s129_s15] sm:$0xff]  ;;  %vm145_vm1 = vcmask 1043456   ;;  %p180_p6 = scmp.eq.s32.totalorder %s348_s6, 1  ;;  %vm159_vm2 = vcmask 0  }
  0x18   : > { %v143_v2 = vcombine.high %v140_v1, %v140_v1  ;;  %v146_v3 = vsel %vm145_vm1, %v140_v1, 0.0  ;;  %v162_v4 = vmul.f32 %v140_v1, %v140_v1  ;;  %v141_v23 = vld [vmem:[#allocation2] sm:$0x1]  ;;  %v161_v28 = vld [vmem:[#allocation3] sm:$0x1] }
  0x1a   : > { %v147_v5 = vsel %vm145_vm1, %v143_v2, 0.0  ;;  %v164_v6 = vcombine.high %v162_v4, %v162_v4  ;;  %v166_v7 = vsel %vm145_vm1, %v162_v4, 0.0 }
  0x1b   : > { %v148_v8 = vadd.f32 %v147_v5, %v146_v3 }
  0x1c   : > { %v167_v9 = vsel %vm145_vm1, %v164_v6, 0.0 }
  0x1d   : > { %149 = vadd.xlane.f32.xlu0 %v148_v8  ;;  %v168_v10 = vadd.f32 %v167_v9, %v166_v7 }
  0x21   : > { %169 = vadd.xlane.f32.xlu0 %v168_v10 }
  0xaa   : > { %v150_v11 = vpop.xlane.xlu0 %149 }
  0xab   : > { %v151_v12 = vsel %vm145_vm1, %v150_v11, 0.0 }
  0xac   : > { %v152_v13 = vrot.slane %v151_v12, 4 }
  0xae   : > { %v153_v14 = vadd.f32 %v152_v13, %v151_v12  ;;  %v170_v15 = vpop.xlane.xlu0 %169 }
  0xaf   : > { %v171_v16 = vsel %vm145_vm1, %v170_v15, 0.0 }
  0xb0   : > { %v154_v17 = vrot.slane %v153_v14, 2  ;;  %v172_v18 = vrot.slane %v171_v16, 4 }
  0xb2   : > { %v155_v19 = vadd.f32 %v154_v17, %v153_v14  ;;  %v173_v20 = vadd.f32 %v172_v18, %v171_v16 }
  0xb4   : > { %v156_v21 = vrot.slane %v155_v19, 1  ;;  %v174_v22 = vrot.slane %v173_v20, 2 }
  0xb6   : > { %v157_v24 = vadd.f32 %v156_v21, %v155_v19  ;;  %v175_v25 = vadd.f32 %v174_v22, %v173_v20 }
  0xb8   : > { %v158_v26 = vadd.f32 %v157_v24, %v141_v23  ;;  %v176_v27 = vrot.slane %v175_v25, 1  ;;  %184 = sbr.rel (!%p180_p6) target bundleno = 214 (0xd6), region = 32 }
  0xba   : > { %160 = vst.msk [vmem:[#allocation2] sm:$0x1] %vm159_vm2, %v158_v26  ;;  %v177_v29 = vadd.f32 %v176_v27, %v175_v25 }
  0xbc   : > { %v178_v30 = vadd.f32 %v177_v29, %v161_v28 }
  0xbe   : > { %179 = vst.msk [vmem:[#allocation3] sm:$0x1] %vm159_vm2, %v178_v30 }
  0xc1   : > { %v185_v31 = vld [vmem:[#allocation2] sm:$0x1] }
  0xc2   : > { %v187_v32 = vmul.f32 %v185_v31, %v185_v31 }
  0xc4   : > { %v188_v34 = vmul.f32 0.00048828125, %v187_v32 }
  0xc5   : > { %v186_v33 = vld [vmem:[#allocation3] sm:$0x1] }
  0xc6   : > { %v189_v35 = vsub.f32 %v186_v33, %v188_v34 }
  0xc8   : > { %v190_v36 = vmul.f32 0.0004885198, %v189_v35 }
  0xca   : > { %302 = vrsqrt.f32 %v190_v36 }
  0xd4   : > { %v303_v37 = vpop.eup %302 }
  0xd5   : > { %192 = vst.msk [vmem:[#allocation4] sm:$0x1] %vm159_vm2, %v303_v37 }
  0xd6 PF: > { %p411_p7 = scmp.eq.s32.totalorder %s254_s9, 1  ;;  %s359_s17 = smov [#allocation4]  }
  0xd7   : > { %s200_s18 = sshll.u32 %s359_s17, 4  ;;  %s201_s18 = int_to_ptr.vmem [resolvable:$true] %s200_s18 }
  0xd8   : > { %s304_s19 = scalar_lea.vmem %s201_s18, 16  ;;  %s310_s20 = scalar_lea.vmem %s201_s18, 32 }
  0xd9   : > { %p305_p8 = scmp.ne.s32.totalorder %s201_s18, %s304_s19  ;;  %p311_p11 = scmp.lt.s32.totalorder %s201_s18, %s201_s18 }
  0xda   : > { %p312_p12 = scmp.lt.s32.totalorder %s310_s20, %s304_s19 }
  0xdb   : > { %p306_p9 = pnand %p305_p8, %p411_p7 }
  0xdc   : > { %p313_p13 = por %p312_p12, %p311_p11 }
  0xdd   : > { %p307_p10 = pneg %p306_p9 }
  0xdf   : > { %p314_p0 = pnand %p313_p13, %p307_p10 }
  0xe1   : > { %317 = shalt.err (!%p314_p0)
}
  0xe2   : > { %s318_s23 = scalar_lea.hbm %s447_s1, 16 }
  0xe3   : > { %p319_p1 = scmp.ne.s32.totalorder %s447_s1, %s318_s23  ;;  %p324_p4 = scmp.lt.u32.totalorder %s318_s23, %s447_s1 }
  0xe5   : > { %p320_p2 = pnand %p319_p1, %p411_p7 }
  0xe7   : > { %p321_p3 = pneg %p320_p2 }
  0xe9   : > { %p326_p5 = pnand %p324_p4, %p321_p3 }
  0xeb   : > { %329 = shalt.err (!%p326_p5)
}
  0xec   : > { %270 = dma.vmem_to_hbm [thread:$0]  (%p411_p7), %s201_s18, 16, %s447_s1, [#allocation5]  }
  0xed   : > { %343 = dma.done.wait (%p411_p7), [#allocation5], 16  }
  0xee   : > { %345 = vsyncadd (%p411_p7), [#allocation5], 4294967280 }
  0xef PF: > { %s12_s8 = sadd.s32 1, %s356_s8   ;;  %s449_s6 = smov %s352_s7 }
  0xf0   : > { %p9_p6 = scmp.ge.s32.totalorder %s12_s8, 4   ;;  %s450_s7 = smov %s452_s10 }
  0xf2   :  { %11 = sbr.rel (!%p9_p6) target bundleno = 2 (0x2), region = 59 }
  0xf9   :  { %213 = vsyncpa [#allocation5], 1 }
  0xfa   :  { %215 = vsyncpa [#allocation5 + $0x1], 1 }

// kernel: ddpm_forward.6
= control target key start
LH: loop header
LB: loop body
LE: loop exit
PB: predicated region body
PF: predicated region fallthrough
CT: control target
= control target key end

     0   :  { %v41_v0 = vlaneseq  ;;  %vm81_vm0 = vcmask 1043456   ;;  %v1221_v4 = vmov 0.0   ;;  %vm77_vm1 = vcmask 31744   ;;  %s1693_s4 = inlined_call_operand.vmem [shape: f32[4,768], index: 4, kind: input, shape index: {}]   ;;  %s1694_s0 = inlined_call_operand.vmem [shape: f32[2,4], index: 0, kind: input, shape index: {}]   ;;  %s1695_s6 = inlined_call_operand.vmem [shape: f32[2,768], index: 6, kind: input, shape index: {}]   ;;  %s1696_s1 = inlined_call_operand.vmem [shape: f32[2,1], index: 1, kind: input, shape index: {}]   ;;  %s1697_s8 = inlined_call_operand.vmem [shape: f32[768,4], index: 8, kind: input, shape index: {}]   ;;  %s1698_s3 = inlined_call_operand.vmem [shape: f32[2,2], index: 3, kind: input, shape index: {}]   ;;  %s1699_s5 = inlined_call_operand.vmem [shape: f32[1,768], index: 5, kind: input, shape index: {}, may-alias: {5,7}]   ;;  %s1700_s2 = inlined_call_operand.vmem [shape: f32[1,768], index: 2, kind: input, shape index: {}]   ;;  %s1701_s7 = inlined_call_operand.vmem [shape: f32[1,768], index: 7, kind: input, shape index: {}, may-alias: {5,7}]   ;;  %s1702_s9 = inlined_call_operand.vmem [shape: f32[1,4], index: 9, kind: input, shape index: {}]   ;;  %s1703_s10 = inlined_call_operand.vmem [shape: f32[2,4], index: 10, kind: output, shape index: {}]  }
   0x1   :  { %v36_v1 = vld [vmem:[%s1693_s4] sm:$0xff]  ;;  %v37_v2 = vld [vmem:[%s1693_s4 + $0x8] sm:$0xff]  ;;  %v38_v3 = vld [vmem:[%s1693_s4 + $0x10] sm:$0xff]  ;;  %158 = vmatprep.mubr.f32.mxu1 %v1221_v4  ;;  %v1222_v10 = vmov 1983009808   ;;  %v1223_v13 = vmov 0  }
   0x2   :  { %v74_v5 = vcombine.high %v36_v1, %v36_v1  ;;  %v75_v6 = vcombine.high %v37_v2, %v37_v2  ;;  %v35_v7 = vld [vmem:[%s1694_s0] sm:$0x3]  ;;  %v1292_v8 = vshrl.u32 %v41_v0, 7  ;;  %v376_v11 = vunpack.c.l.s4 %v1222_v10  ;;  %1216 = vset.pattern.permute.xlu0 %v1223_v13  ;;  %v690_v16 = vld [vmem:[%s1697_s8 + $0x88] sm:$0xff]  ;;  %v691_v23 = vld [vmem:[%s1697_s8 + $0x90] sm:$0xff] }
   0x3   :  { %v370_v9 = vld [vmem:[%s1695_s6] sm:$0xff]  ;;  %v76_v12 = vcombine.high %v38_v3, %v38_v3  ;;  %v674_v22 = vld [vmem:[%s1697_s8 + $0x8] sm:$0xff]  ;;  %v692_v25 = vld [vmem:[%s1697_s8 + $0x98] sm:$0xff]  ;;  %vm403_vm2 = vcmask 1041408   ;;  %vm399_vm3 = vcmask 15360   ;;  %vm986_vm4 = vcmask 25600  }
   0x4   :  { %992 = vmatprep.subr.msk.mxu1 %vm81_vm0, %v74_v5  ;;  %v307_v14 = vld [vmem:[%s1696_s1] sm:$0x3]  ;;  %v377_v17 = vunpack.c.0.s8 %v376_v11  ;;  %v374_v18 = vcombine.high %v370_v9, %v370_v9  ;;  %v675_v26 = vld [vmem:[%s1697_s8 + $0x10] sm:$0xff]  ;;  %v676_v27 = vld [vmem:[%s1697_s8 + $0x18] sm:$0xff]  ;;  %v1121_v29 = vpack.c.bf16 %v692_v25, %v691_v23 }
   0x5   :  { %v689_v15 = vld [vmem:[%s1697_s8 + $0x80] sm:$0xff]  ;;  %993 = vmatpush1.msk.msra.mxu1 %vm81_vm0, %v36_v1  ;;  %311 = vperm.xlu0 %1216, %v307_v14   ;;  %v351_v19 = vsub.f32 1.0, %v307_v14  ;;  %v694_v31 = vld [vmem:[%s1697_s8 + $0xa8] sm:$0xff]  ;;  %v1123_v34 = vpack.c.bf16 %v676_v27, %v675_v26  ;;  %v695_v39 = vld [vmem:[%s1697_s8 + $0xb0] sm:$0xff] }
   0x6   :  { %v1117_v20 = vpack.c.bf16 %v690_v16, %v689_v15  ;;  %v673_v21 = vld [vmem:[%s1697_s8] sm:$0xff]  ;;  %994 = vmatmul.mubr.msk.f32.vlgmr.msra.gmra.mrb[0].mxu1 %vm77_vm1, %v35_v7  ;;  %995 = vmatprep.subr.msk.mxu1 %vm81_vm0, %v75_v6  ;;  %v380_v28 = vsub.s32 %v377_v17, %v1292_v8  ;;  %v678_v37 = vld [vmem:[%s1697_s8 + $0x28] sm:$0xff]  ;;  %v696_v40 = vld [vmem:[%s1697_s8 + $0xb8] sm:$0xff] }
   0x7   :  { %v1119_v24 = vpack.c.bf16 %v674_v22, %v673_v21  ;;  %996 = vmatpush1.msk.msra.mxu1 %vm81_vm0, %v37_v2  ;;  %229 = vmatprep.mubr.f32.mxu1 %v1221_v4  ;;  %v693_v30 = vld [vmem:[%s1697_s8 + $0xa0] sm:$0xff]  ;;  %v1001_v42 = vld.sshfl [vmem:[%s1695_s6 + $0x8] sm:$0x33 pattern:$0x76325410]  ;;  %v1129_v44 = vpack.c.bf16 %v696_v40, %v695_v39  ;;  %v679_v45 = vld [vmem:[%s1697_s8 + $0x30] sm:$0xff] }
   0x8   :  { %998 = vmatprep.subr.msk.mxu1 %vm81_vm0, %v76_v12  ;;  %1118 = vmatprep.subr.bf16.mxu0 %v1117_v20  ;;  %v381_v32 = vrot.slane %v370_v9, %v380_v28  ;;  %v388_v33 = vrot.slane %v374_v18, %v380_v28  ;;  %v1125_v35 = vpack.c.bf16 %v694_v31, %v693_v30  ;;  %v677_v36 = vld [vmem:[%s1697_s8 + $0x20] sm:$0xff]  ;;  %v680_v46 = vld [vmem:[%s1697_s8 + $0x38] sm:$0xff]  ;;  %v722_v50 = vld [vmem:[%s1697_s8 + $0x188] sm:$0xff] }
   0x9   :  { %354 = vperm.xlu0 %1216, %v351_v19   ;;  %1120 = vmatpush3.bf16.msra.mxu0 %v1119_v24  ;;  %v1127_v43 = vpack.c.bf16 %v678_v37, %v677_v36  ;;  %v369_v47 = vld [vmem:[%s1698_s3] sm:$0x3]  ;;  %v398_v48 = vcombine.high %v1001_v42, %v1001_v42  ;;  %v1131_v51 = vpack.c.bf16 %v680_v46, %v679_v45  ;;  %v706_v54 = vld [vmem:[%s1697_s8 + $0x108] sm:$0xff]  ;;  %v723_v55 = vld [vmem:[%s1697_s8 + $0x190] sm:$0xff] }
   0xa   :  { %997 = vmatmul.mubr.msk.f32.vlgmr.msra.gmra.mrb[2].mxu1 %vm77_vm1, %v35_v7  ;;  %1122 = vmatprep.subr.bf16.mxu0 %v1121_v29  ;;  %v389_v38 = vcombine.high %v381_v32, %v381_v32  ;;  %v390_v41 = vcombine.high %v388_v33, %v388_v33  ;;  %v721_v49 = vld [vmem:[%s1697_s8 + $0x180] sm:$0xff]  ;;  %v724_v56 = vld [vmem:[%s1697_s8 + $0x198] sm:$0xff]  ;;  %v707_v59 = vld [vmem:[%s1697_s8 + $0x110] sm:$0xff] }
   0xb   :  { %999 = vmatpush1.msk.msra.mxu1 %vm81_vm0, %v38_v3  ;;  %300 = vmatprep.mubr.f32.mxu1 %v1221_v4  ;;  %v1149_v52 = vpack.c.bf16 %v722_v50, %v721_v49  ;;  %v705_v53 = vld [vmem:[%s1697_s8 + $0x100] sm:$0xff]  ;;  %v1153_v58 = vpack.c.bf16 %v724_v56, %v723_v55  ;;  %v708_v60 = vld [vmem:[%s1697_s8 + $0x118] sm:$0xff]  ;;  %v726_v62 = vld [vmem:[%s1697_s8 + $0x1a8] sm:$0xff] }
   0xc   :  { %1002 = vmatprep.subr.msk.mxu1 %vm403_vm2, %v389_v38  ;;  %v1151_v57 = vpack.c.bf16 %v706_v54, %v705_v53  ;;  %v725_v61 = vld [vmem:[%s1697_s8 + $0x1a0] sm:$0xff]  ;;  %v1155_v63 = vpack.c.bf16 %v708_v60, %v707_v59  ;;  %v710_v2 = vld [vmem:[%s1697_s8 + $0x128] sm:$0xff]  ;;  %v727_v10 = vld [vmem:[%s1697_s8 + $0x1b0] sm:$0xff] }
   0xd   :  { %1124 = vmatpush3.bf16.msra.mxu0 %v1123_v34  ;;  %v1157_v0 = vpack.c.bf16 %v726_v62, %v725_v61  ;;  %v709_v1 = vld [vmem:[%s1697_s8 + $0x120] sm:$0xff]  ;;  %v698_v5 = vld [vmem:[%s1697_s8 + $0xc8] sm:$0xff]  ;;  %v728_v12 = vld [vmem:[%s1697_s8 + $0x1b8] sm:$0xff]  ;;  %v1529_v62 = vsub.s32 0, %v1292_v8 }
   0xe   :  { %1000 = vmatmul.mubr.msk.f32.vlgmr.msra.gmra.mrb[4].mxu1 %vm77_vm1, %v35_v7  ;;  %1126 = vmatprep.subr.bf16.mxu0 %v1125_v35  ;;  %v1159_v3 = vpack.c.bf16 %v710_v2, %v709_v1  ;;  %v681_v7 = vld [vmem:[%s1697_s8 + $0x40] sm:$0xff]  ;;  %v682_v9 = vld [vmem:[%s1697_s8 + $0x48] sm:$0xff]  ;;  %v711_v13 = vld [vmem:[%s1697_s8 + $0x130] sm:$0xff]  ;;  %v1161_v15 = vpack.c.bf16 %v728_v12, %v727_v10 }
   0xf   :  { %1003 = vmatpush1.msk.msra.mxu1 %vm403_vm2, %v381_v32  ;;  %480 = vmatprep.mubr.f32.mxu1 %v1221_v4  ;;  %v1135_v11 = vpack.c.bf16 %v682_v9, %v681_v7  ;;  %v712_v14 = vld [vmem:[%s1697_s8 + $0x138] sm:$0xff]  ;;  %v699_v17 = vld [vmem:[%s1697_s8 + $0xd0] sm:$0xff]  ;;  %v729_v22 = vld [vmem:[%s1697_s8 + $0x1c0] sm:$0xff] }
  0x10   :  { %1005 = vmatprep.subr.msk.mxu1 %vm403_vm2, %v390_v41  ;;  %v1163_v16 = vpack.c.bf16 %v712_v14, %v711_v13  ;;  %v700_v18 = vld [vmem:[%s1697_s8 + $0xd8] sm:$0xff]  ;;  %v683_v20 = vld [vmem:[%s1697_s8 + $0x50] sm:$0xff]  ;;  %v730_v24 = vld [vmem:[%s1697_s8 + $0x1c8] sm:$0xff] }
  0x11   :  { %1128 = vmatpush3.bf16.msra.mxu0 %v1127_v43  ;;  %v1137_v19 = vpack.c.bf16 %v700_v18, %v699_v17  ;;  %v684_v21 = vld [vmem:[%s1697_s8 + $0x58] sm:$0xff]  ;;  %v713_v25 = vld [vmem:[%s1697_s8 + $0x140] sm:$0xff]  ;;  %v714_v26 = vld [vmem:[%s1697_s8 + $0x148] sm:$0xff]  ;;  %v1165_v27 = vpack.c.bf16 %v730_v24, %v729_v22 }
  0x12   :  { %1004 = vmatmul.mubr.msk.f32.vlgmr.msra.gmra.mrb[6].mxu1 %vm399_vm3, %v369_v47  ;;  %1130 = vmatprep.subr.bf16.mxu0 %v1129_v44  ;;  %v1139_v23 = vpack.c.bf16 %v684_v21, %v683_v20  ;;  %v1167_v28 = vpack.c.bf16 %v714_v26, %v713_v25  ;;  %v701_v29 = vld [vmem:[%s1697_s8 + $0xe0] sm:$0xff]  ;;  %v702_v30 = vld [vmem:[%s1697_s8 + $0xe8] sm:$0xff]  ;;  %v731_v34 = vld [vmem:[%s1697_s8 + $0x1d0] sm:$0xff]  ;;  %v1562_v20 = vsub.s32 5, %v1292_v8 }
  0x13   :  { %1006 = vmatpush1.msk.msra.mxu1 %vm403_vm2, %v388_v33  ;;  %551 = vmatprep.mubr.f32.mxu1 %v1221_v4  ;;  %v1141_v31 = vpack.c.bf16 %v702_v30, %v701_v29  ;;  %v685_v32 = vld [vmem:[%s1697_s8 + $0x60] sm:$0xff]  ;;  %v686_v33 = vld [vmem:[%s1697_s8 + $0x68] sm:$0xff]  ;;  %v732_v36 = vld [vmem:[%s1697_s8 + $0x1d8] sm:$0xff] }
  0x14   :  { %1008 = vmatprep.subr.msk.mxu1 %vm403_vm2, %v398_v48  ;;  %v1143_v35 = vpack.c.bf16 %v686_v33, %v685_v32  ;;  %v715_v37 = vld [vmem:[%s1697_s8 + $0x150] sm:$0xff]  ;;  %v716_v38 = vld [vmem:[%s1697_s8 + $0x158] sm:$0xff]  ;;  %v1169_v39 = vpack.c.bf16 %v732_v36, %v731_v34  ;;  %v734_v48 = vld [vmem:[%s1697_s8 + $0x1e8] sm:$0xff] }
  0x15   :  { %1132 = vmatpush3.bf16.msra.mxu0 %v1131_v51  ;;  %v1171_v40 = vpack.c.bf16 %v716_v38, %v715_v37  ;;  %v703_v41 = vld [vmem:[%s1697_s8 + $0xf0] sm:$0xff]  ;;  %v688_v45 = vld [vmem:[%s1697_s8 + $0x78] sm:$0xff]  ;;  %v717_v49 = vld [vmem:[%s1697_s8 + $0x160] sm:$0xff] }
  0x16   :  { %1007 = vmatmul.mubr.msk.f32.vlgmr.msra.gmra.mrb[8].mxu1 %vm399_vm3, %v369_v47  ;;  %v687_v44 = vld [vmem:[%s1697_s8 + $0x70] sm:$0xff]  ;;  %v718_v51 = vld [vmem:[%s1697_s8 + $0x168] sm:$0xff]  ;;  %v753_v53 = vld [vmem:[%s1697_s8 + $0x280] sm:$0xff] }
  0x17   :  { %1009 = vmatpush1.msk.msra.mxu1 %vm403_vm2, %v1001_v42  ;;  %622 = vmatprep.mubr.f32.mxu1 %v1221_v4  ;;  %v697_v4 = vld [vmem:[%s1697_s8 + $0xc0] sm:$0xff]  ;;  %v704_v42 = vld [vmem:[%s1697_s8 + $0xf8] sm:$0xff]  ;;  %v1147_v46 = vpack.c.bf16 %v688_v45, %v687_v44  ;;  %v754_v54 = vld [vmem:[%s1697_s8 + $0x288] sm:$0xff] }
  0x18   :  { %1150 = vmatprep.subr.bf16.mxu1 %v1149_v52  ;;  %v1133_v6 = vpack.c.bf16 %v698_v5, %v697_v4  ;;  %v1145_v43 = vpack.c.bf16 %v704_v42, %v703_v41  ;;  %v1175_v52 = vpack.c.bf16 %v718_v51, %v717_v49  ;;  %v1181_v55 = vpack.c.bf16 %v754_v54, %v753_v53  ;;  %v735_v56 = vld [vmem:[%s1697_s8 + $0x1f0] sm:$0xff]  ;;  %v720_v60 = vld [vmem:[%s1697_s8 + $0x178] sm:$0xff]  ;;  %v1550_v7 = vld [vmem:[%s1700_s2] sm:$0x3f] }
  0x19   :  { %v719_v59 = vld [vmem:[%s1697_s8 + $0x170] sm:$0xff]  ;;  %v318_v12 = vrot.slane %v1550_v7, %v1529_v62  ;;  %v737_v45 = vld [vmem:[%s1697_s8 + $0x200] sm:$0xff] }
  0x1a   :  { %1010 = vmatmul.mubr.msk.f32.vlgmr.msra.gmra.mrb[10].mxu1 %vm399_vm3, %v369_v47  ;;  %1134 = vmatprep.subr.bf16.mxu0 %v1133_v6  ;;  %v733_v47 = vld [vmem:[%s1697_s8 + $0x1e0] sm:$0xff]  ;;  %v1179_v61 = vpack.c.bf16 %v720_v60, %v719_v59  ;;  %v1545_v6 = vsub.s32 3, %v1292_v8  ;;  %v755_v51 = vld [vmem:[%s1697_s8 + $0x290] sm:$0xff] }
  0x1b   :  { %1152 = vmatpush3.bf16.msra.mxu1 %v1151_v57  ;;  %1136 = vmatpush3.bf16.msra.mxu0 %v1135_v11  ;;  %v1173_v50 = vpack.c.bf16 %v734_v48, %v733_v47  ;;  %v736_v57 = vld [vmem:[%s1697_s8 + $0x1f8] sm:$0xff] }
  0x1c   :  { %1154 = vmatprep.subr.bf16.mxu1 %v1153_v58  ;;  %1138 = vmatprep.subr.bf16.mxu0 %v1137_v19  ;;  %v1177_v58 = vpack.c.bf16 %v736_v57, %v735_v56  ;;  %v1559_v19 = vsub.s32 4, %v1292_v8  ;;  %v330_v32 = vrot.slane %v1550_v7, %v1545_v6 }
  0x1e   :  { %v334_v47 = vrot.slane %v1550_v7, %v1559_v19 }
  0x1f   :  { %1156 = vmatpush3.bf16.msra.mxu1 %v1155_v63  ;;  %1140 = vmatpush3.bf16.msra.mxu0 %v1139_v23  ;;  %v39_v63 = vld [vmem:[%s1699_s5] sm:$0x3f] }
  0x20   :  { %1158 = vmatprep.subr.bf16.mxu1 %v1157_v0  ;;  %1142 = vmatprep.subr.bf16.mxu0 %v1141_v31  ;;  %v1535_v0 = vsub.s32 1, %v1292_v8  ;;  %v44_v2 = vrot.slane %v39_v63, %v1529_v62  ;;  %v60_v23 = vrot.slane %v39_v63, %v1559_v19 }
  0x22   :  { %v48_v5 = vrot.slane %v39_v63, %v1535_v0  ;;  %v322_v17 = vrot.slane %v1550_v7, %v1535_v0 }
  0x23   :  { %1160 = vmatpush3.bf16.msra.mxu1 %v1159_v3  ;;  %1144 = vmatpush3.bf16.msra.mxu0 %v1143_v35  ;;  %v1541_v3 = vsub.s32 2, %v1292_v8  ;;  %v1573_v8 = vld [vmem:[%s1701_s7] sm:$0x3f] }
  0x24   :  { %1162 = vmatprep.subr.bf16.mxu1 %v1161_v15  ;;  %1146 = vmatprep.subr.bf16.mxu0 %v1145_v43  ;;  %v644_v41 = vrot.slane %v1573_v8, %v1535_v0  ;;  %v640_v43 = vrot.slane %v1573_v8, %v1529_v62  ;;  %v652_v56 = vrot.slane %v1573_v8, %v1545_v6 }
  0x25   :  { %v52_v11 = vrot.slane %v39_v63, %v1541_v3  ;;  %v326_v21 = vrot.slane %v1550_v7, %v1541_v3 }
  0x27   :  { %1164 = vmatpush3.bf16.msra.mxu1 %v1163_v16  ;;  %1148 = vmatpush3.bf16.msra.mxu0 %v1147_v46  ;;  %v56_v16 = vrot.slane %v39_v63, %v1545_v6  ;;  %v738_v46 = vld [vmem:[%s1697_s8 + $0x208] sm:$0xff] }
  0x28   :  { %1166 = vmatprep.subr.bf16.mxu1 %v1165_v27  ;;  %1182 = vmatprep.subr.bf16.mxu0 %v1181_v55  ;;  %v648_v55 = vrot.slane %v1573_v8, %v1541_v3  ;;  %v740_v3 = vld [vmem:[%s1697_s8 + $0x218] sm:$0xff] }
  0x2b   :  { %1168 = vmatpush3.bf16.msra.mxu1 %v1167_v28  ;;  %v64_v28 = vrot.slane %v39_v63, %v1562_v20 }
  0x2c   :  { %1170 = vmatprep.subr.bf16.mxu1 %v1169_v39 }
  0x2f   :  { %1172 = vmatpush3.bf16.msra.mxu1 %v1171_v40 }
  0x30   :  { %1174 = vmatprep.subr.bf16.mxu1 %v1173_v50  ;;  %v338_v50 = vrot.slane %v1550_v7, %v1562_v20 }
  0x33   :  { %1176 = vmatpush3.bf16.msra.mxu1 %v1175_v52  ;;  %v756_v52 = vld [vmem:[%s1697_s8 + $0x298] sm:$0xff] }
  0x34   :  { %1178 = vmatprep.subr.bf16.mxu1 %v1177_v58 }
  0x37   :  { %1180 = vmatpush3.bf16.msra.mxu1 %v1179_v61  ;;  %v1183_v61 = vpack.c.bf16 %v738_v46, %v737_v45 }
  0x84   :  { %v1537_v1 = vpop.permute.xlu0 %311 }
  0x85   :  { %v345_v24 = vmul.f32 %v318_v12, %v1537_v1  ;;  %v346_v29 = vmul.f32 %v322_v17, %v1537_v1  ;;  %v347_v36 = vmul.f32 %v326_v21, %v1537_v1  ;;  %v348_v49 = vmul.f32 %v330_v32, %v1537_v1  ;;  %v762_v32 = vld [vmem:[%s1697_s8 + $0x2c8] sm:$0xff] }
  0x86   :  { %v350_v7 = vmul.f32 %v338_v50, %v1537_v1  ;;  %v768_v50 = vld [vmem:[%s1697_s8 + $0x2f8] sm:$0xff] }
  0x88   :  { %v355_v14 = vpop.permute.xlu0 %354 }
  0xd9   :  { %v160_v4 = vpop.f32.mrb[0].mxu1 }
  0xda   :  { %v162_v9 = vpop.f32.mrb[1].mxu1  ;;  %v161_v10 = vadd.f32 %v160_v4, %v44_v2  ;;  %v349_v2 = vmul.f32 %v334_v47, %v1537_v1  ;;  %v1185_v4 = vpack.c.bf16 %v756_v52, %v755_v51  ;;  %v749_v47 = vld [vmem:[%s1697_s8 + $0x260] sm:$0xff] }
  0xdb   :  { %v163_v13 = vadd.f32 %v162_v9, %v48_v5  ;;  %v739_v5 = vld [vmem:[%s1697_s8 + $0x210] sm:$0xff]  ;;  %v757_v9 = vld [vmem:[%s1697_s8 + $0x2a0] sm:$0xff] }
  0xdc   :  { %v357_v25 = vmul.f32 %v355_v14, %v161_v10  ;;  %v758_v10 = vld [vmem:[%s1697_s8 + $0x2a8] sm:$0xff] }
  0xdd   :  { %v231_v15 = vpop.f32.mrb[2].mxu1  ;;  %v358_v30 = vmul.f32 %v355_v14, %v163_v13  ;;  %v1189_v21 = vpack.c.bf16 %v758_v10, %v757_v9 }
  0xde   :  { %v233_v18 = vpop.f32.mrb[3].mxu1  ;;  %v232_v22 = vadd.f32 %v231_v15, %v52_v11  ;;  %v363_v35 = vadd.f32 %v357_v25, %v345_v24  ;;  %v660_v15 = vrot.slane %v1573_v8, %v1562_v20  ;;  %v759_v20 = vld [vmem:[%s1697_s8 + $0x2b0] sm:$0xff]  ;;  %v760_v25 = vld [vmem:[%s1697_s8 + $0x2b8] sm:$0xff] }
  0xdf   :  { %v234_v26 = vadd.f32 %v233_v18, %v56_v16  ;;  %v364_v40 = vadd.f32 %v358_v30, %v346_v29  ;;  %v1187_v16 = vpack.c.bf16 %v740_v3, %v739_v5  ;;  %v743_v29 = vld [vmem:[%s1697_s8 + $0x230] sm:$0xff]  ;;  %v744_v30 = vld [vmem:[%s1697_s8 + $0x238] sm:$0xff] }
  0xe0   :  { %v359_v33 = vmul.f32 %v355_v14, %v232_v22  ;;  %v741_v22 = vld [vmem:[%s1697_s8 + $0x220] sm:$0xff] }
  0xe1   :  { %v302_v27 = vpop.f32.mrb[4].mxu1  ;;  %v360_v37 = vmul.f32 %v355_v14, %v234_v26 }
  0xe2   :  { %v304_v31 = vpop.f32.mrb[5].mxu1  ;;  %v303_v34 = vadd.f32 %v302_v27, %v60_v23  ;;  %v365_v54 = vadd.f32 %v359_v33, %v347_v36  ;;  %v742_v23 = vld [vmem:[%s1697_s8 + $0x228] sm:$0xff]  ;;  %v1195_v33 = vpack.c.bf16 %v744_v30, %v743_v29 }
  0xe3   :  { %v305_v38 = vadd.f32 %v304_v31, %v64_v28  ;;  %v366_v59 = vadd.f32 %v360_v37, %v348_v49  ;;  %v1191_v27 = vpack.c.bf16 %v742_v23, %v741_v22  ;;  %v1193_v28 = vpack.c.bf16 %v760_v25, %v759_v20  ;;  %v761_v31 = vld [vmem:[%s1697_s8 + $0x2c0] sm:$0xff]  ;;  %v746_v36 = vld [vmem:[%s1697_s8 + $0x248] sm:$0xff]  ;;  %v763_v37 = vld [vmem:[%s1697_s8 + $0x2d0] sm:$0xff] }
  0xe4   :  { %v361_v53 = vmul.f32 %v355_v14, %v303_v34  ;;  %v1197_v34 = vpack.c.bf16 %v762_v32, %v761_v31  ;;  %v767_v49 = vld [vmem:[%s1697_s8 + $0x2f0] sm:$0xff] }
  0xe5   :  { %v482_v39 = vpop.f32.mrb[6].mxu1  ;;  %v362_v57 = vmul.f32 %v355_v14, %v305_v38  ;;  %v764_v38 = vld [vmem:[%s1697_s8 + $0x2d8] sm:$0xff]  ;;  %v1209_v52 = vpack.c.bf16 %v768_v50, %v767_v49 }
  0xe6   :  { %v629_v42 = vadd.f32 %v482_v39, %v363_v35  ;;  %v484_v44 = vpop.f32.mrb[7].mxu1  ;;  %v367_v11 = vadd.f32 %v361_v53, %v349_v2  ;;  %v745_v35 = vld [vmem:[%s1697_s8 + $0x240] sm:$0xff]  ;;  %v751_v53 = vld [vmem:[%s1697_s8 + $0x270] sm:$0xff] }
  0xe7   :  { %v630_v48 = vadd.f32 %v484_v44, %v364_v40  ;;  %v368_v14 = vadd.f32 %v362_v57, %v350_v7  ;;  %v1199_v39 = vpack.c.bf16 %v746_v36, %v745_v35  ;;  %v1201_v40 = vpack.c.bf16 %v764_v38, %v763_v37  ;;  %v766_v44 = vld [vmem:[%s1697_s8 + $0x2e8] sm:$0xff] }
  0xe8   :  { %v667_v62 = vadd.f32 %v640_v43, %v629_v42  ;;  %v748_v42 = vld [vmem:[%s1697_s8 + $0x258] sm:$0xff]  ;;  %v765_v43 = vld [vmem:[%s1697_s8 + $0x2e0] sm:$0xff] }
  0xe9   :  { %v553_v58 = vpop.f32.mrb[8].mxu1  ;;  %v668_v60 = vadd.f32 %v644_v41, %v630_v48  ;;  %v747_v41 = vld [vmem:[%s1697_s8 + $0x250] sm:$0xff]  ;;  %v1205_v46 = vpack.c.bf16 %v766_v44, %v765_v43  ;;  %v750_v48 = vld [vmem:[%s1697_s8 + $0x268] sm:$0xff] }
  0xea   :  { %v631_v63 = vadd.f32 %v553_v58, %v365_v54  ;;  %v555_v0 = vpop.f32.mrb[9].mxu1  ;;  %v1203_v45 = vpack.c.bf16 %v748_v42, %v747_v41  ;;  %v1207_v51 = vpack.c.bf16 %v750_v48, %v749_v47  ;;  %v752_v54 = vld [vmem:[%s1697_s8 + $0x278] sm:$0xff] }
  0xeb   :  { %v632_v6 = vadd.f32 %v555_v0, %v366_v59  ;;  %840 = vmatprep.mubr.f32.mxu0 %v668_v60 }
  0xec   :  { %841 = vmatmul.mubr.f32.vlgmr.msra.gmra.mrb[0].mxu0 %v667_v62  ;;  %v669_v17 = vadd.f32 %v648_v55, %v631_v63  ;;  %v1211_v55 = vpack.c.bf16 %v752_v54, %v751_v53 }
  0xed   :  { %v670_v12 = vadd.f32 %v652_v56, %v632_v6  ;;  %1184 = vmatpush3.bf16.msra.mxu0 %v1183_v61  ;;  %v624_v13 = vpop.f32.mrb[10].mxu1  ;;  %v656_v56 = vrot.slane %v1573_v8, %v1559_v19  ;;  %v1011_v61 = vld [vmem:[%s1702_s9] ss:$0 sm:$0xff] }
  0xee   :  { %v633_v1 = vadd.f32 %v624_v13, %v367_v11  ;;  %v626_v18 = vpop.f32.mrb[11].mxu1  ;;  %1186 = vmatprep.subr.bf16.mxu0 %v1185_v4 }
  0xef   :  { %v634_v24 = vadd.f32 %v626_v18, %v368_v14  ;;  %910 = vmatprep.mubr.f32.mxu1 %v670_v12 }
  0xf0   :  { %911 = vmatmul.mubr.f32.vlgmr.msra.gmra.mrb[12].mxu1 %v669_v17  ;;  %v671_v57 = vadd.f32 %v656_v56, %v633_v1 }
  0xf1   :  { %v672_v26 = vadd.f32 %v660_v15, %v634_v24  ;;  %1188 = vmatpush3.bf16.msra.mxu0 %v1187_v16 }
  0xf2   :  { %1190 = vmatprep.subr.bf16.mxu0 %v1189_v21 }
  0xf3   :  { %980 = vmatprep.mubr.f32.mxu0 %v672_v26 }
  0xf5   :  { %1192 = vmatpush3.bf16.msra.mxu0 %v1191_v27 }
  0xf6   :  { %1194 = vmatprep.subr.bf16.mxu0 %v1193_v28 }
  0xf9   :  { %1196 = vmatpush3.bf16.msra.mxu0 %v1195_v33 }
  0xfa   :  { %1198 = vmatprep.subr.bf16.mxu0 %v1197_v34 }
  0xfd   :  { %1200 = vmatpush3.bf16.msra.mxu0 %v1199_v39 }
  0xfe   :  { %1202 = vmatprep.subr.bf16.mxu0 %v1201_v40 }
 0x101   :  { %1204 = vmatpush3.bf16.msra.mxu0 %v1203_v45 }
 0x102   :  { %1206 = vmatprep.subr.bf16.mxu0 %v1205_v46 }
 0x105   :  { %1208 = vmatpush3.bf16.msra.mxu0 %v1207_v51 }
 0x106   :  { %1210 = vmatprep.subr.bf16.mxu0 %v1209_v52 }
 0x109   :  { %1212 = vmatpush3.bf16.msra.mxu0 %v1211_v55 }
 0x10c   :  { %981 = vmatmul.mubr.f32.vlgmr.msra.gmra.mrb[2].mxu0 %v671_v57 }
 0x1bf   :  { %v1044_v58 = vpop.f32.mrb[0].mxu0 }
 0x1c0   :  { %v1045_v59 = vpop.f32.mrb[1].mxu0 }
 0x1c1   :  { %v1046_v60 = vadd.f32 %v1045_v59, %v1044_v58 }
 0x1c3   :  { %v1079_v62 = vpop.f32.mrb[12].mxu1  ;;  %v843_v0 = vadd.f32 %v1046_v60, %v1011_v61 }
 0x1c4   :  { %v1080_v63 = vpop.f32.mrb[13].mxu1 }
 0x1c5   :  { %v1081_v2 = vadd.f32 %v1080_v63, %v1079_v62 }
 0x1c7   :  { %v913_v4 = vadd.f32 %v1081_v2, %v843_v0 }
 0x1df   :  { %v1114_v5 = vpop.f32.mrb[2].mxu0 }
 0x1e0   :  { %v1115_v3 = vpop.f32.mrb[3].mxu0 }
 0x1e1   :  { %v1116_v6 = vadd.f32 %v1115_v3, %v1114_v5 }
 0x1e3   :  { %v983_v19 = vadd.f32 %v1116_v6, %v913_v4 }
 0x1e5   :  { %987 = vst.msk [vmem:[%s1703_s10] sm:$0x3] %vm986_vm4, %v983_v19 }

// kernel: ddpm_forward.7
= control target key start
LH: loop header
LB: loop body
LE: loop exit
PB: predicated region body
PF: predicated region fallthrough
CT: control target
= control target key end

     0   :  { %12 = vsyncpa [#allocation3], 0  ;;  %s852_s24 = smov 0   ;;  %s854_s25 = smov 0   ;;  %s942_s0 = inlined_call_operand.vmem [shape: f32[2,3], index: 0, kind: input, shape index: {}]   ;;  %s943_s1 = inlined_call_operand.vmem [shape: f32[2,4,256], index: 1, kind: input, shape index: {}]   ;;  %s944_s2 = inlined_call_operand.vmem [shape: f32[2,4,256], index: 2, kind: input, shape index: {}]   ;;  %s945_s3 = inlined_call_operand.vmem [shape: f32[2,4,256], index: 3, kind: input, shape index: {}]   ;;  %s946_s4 = inlined_call_operand.vmem [shape: bf16[4,4], index: 4, kind: input, shape index: {}]   ;;  %s947_s5 = inlined_call_operand.vmem [shape: bf16[4,4], index: 5, kind: input, shape index: {}]   ;;  %s948_s6 = inlined_call_operand.vmem [shape: f32[2,4,1], index: 6, kind: input, shape index: {}]   ;;  %s949_s7 = inlined_call_operand.vmem [shape: f32[2,1,1], index: 7, kind: output, shape index: {}]  }
   0x1   :  { %s856_s26 = smov 0  }
   0x2 LB: > { %s703_s27 = sadd.s32 4294967295, %s807_s26   ;;  %s30_s28 = sadd.s32 1, %s803_s25  ;;  %s807_s26 = sphi %s856_s26, %s18_s26   ;;  %s803_s25 = sphi %s854_s25, %s953_s25   ;;  %s799_s24 = sphi %s852_s24, %s952_s24  }
   0x3   : > { %p32_p0 = scmp.ge.s32.totalorder %s30_s28, 2  ;;  %p705_p1 = scmp.ge.s32.totalorder %s807_s26, 1 }
   0x4   : > { %p234_p2 = scmp.lt.s32.totalorder %s807_s26, 3  ;;  %p877_p4 = scmp.eq.s32.totalorder %s703_s27, 0 }
   0x5   : > { %s955_s28 = smov (%p32_p0, %s30_s28), 0  ;;  %s247_s10 = sshll.u32 %s942_s0, 4  ;;  %s248_s10 = int_to_ptr.vmem [resolvable:$true] %s247_s10 }
   0x6   : > { %p873_p3 = pnand %p705_p1, %p234_p2  ;;  %s766_s11 = scalar_lea.vmem %s248_s10, 32 }
   0x7   : > { %p767_p7 = scmp.ne.s32.totalorder %s248_s10, %s766_s11  ;;  %p774_p11 = scmp.lt.s32.totalorder %s248_s10, %s248_s10 }
   0x8   : > { %p731_p5 = pneg %p873_p3  ;;  %p775_p12 = scmp.lt.s32.totalorder %s766_s11, %s766_s11 }
   0xa   : > { %p732_p6 = pnand %p877_p4, %p731_p5  ;;  %p776_p13 = por %p775_p12, %p774_p11 }
   0xc   : > { %p768_p8 = pneg %p732_p6 }
   0xe   : > { %p769_p9 = pnand %p768_p8, %p767_p7 }
  0x10   : > { %p770_p10 = pneg %p769_p9 }
  0x12   : > { %p777_p0 = pnand %p776_p13, %p770_p10 }
  0x14   : > { %780 = shalt.err (!%p777_p0)
}
  0x15   : > { %s809_s12 = smov [#allocation2]   ;;  %312 = sbr.rel (%p873_p3) target bundleno = 446 (0x1be), region = 48 }
  0x16   : > { %734 = dma.vmem_to_smem (!%p732_p6), %s248_s10, 32, %s809_s12, [#allocation3]  }
  0x1c   : > { %794 = dma.done.wait (%p877_p4), [#allocation3], 32  }
  0x1d   : > { %796 = vsyncadd (%p877_p4), [#allocation3], 4294967264 }
  0x1e   : > { %318 = sfence }
  0x1f   : > { %p370_p1 = scmp.lt.s32.totalorder %s799_s24, 1  ;;  %s717_s13 = sshll.u32 %s799_s24, 7  ;;  %v810_v0 = vmov 0   ;;  %vm445_vm0 = vcmask 1041408   ;;  %v435_v20 = vld [vmem:[%s947_s5] sm:$0x3] }
  0x20   : > { %s411_s14 = sadd.s32 2, %s717_s13  ;;  %s408_s15 = sld [smem:[#allocation2 + %s717_s13]]  ;;  %484 = vmatprep.mubr.bf16.mxu0 %v810_v0  ;;  %534 = vmatprep.mubr.bf16.mxu1 %v810_v0  ;;  %vm441_vm1 = vcmask 31744   ;;  %v429_v21 = vld [vmem:[%s946_s4] sm:$0x3]  ;;  %vm417_vm2 = vcmask 0  }
  0x21   : > { %s957_s24 = smov (!%p370_p1, %s799_s24), 1  ;;  %764 = vset.pattern.permute.xlu0 %v810_v0  ;;  %s412_s16 = sld [smem:[#allocation2 + %s411_s14]]  ;;  %v811_v22 = vmov 0.0   ;;  %vm559_vm3 = vcmask 1043456  }
  0x22   : > { %s409_s17 = sadd.s32 1, %s717_s13  ;;  %s724_s18 = sshll.u32 %s957_s24, 3 }
  0x23   : > { %s410_s19 = sld [smem:[#allocation2 + %s409_s17]]  ;;  %s397_s22 = scalar_lea.vmem %s945_s3, %s724_s18 }
  0x24   : > { %s377_s29 = scalar_lea.vmem %s943_s1, %s724_s18  ;;  %s387_s9 = scalar_lea.vmem %s944_s2, %s724_s18  ;;  %v426_v2 = vld [vmem:[%s397_s22] sm:$0xff] }
  0x25   : > { %v419_v1 = vld [vmem:[%s377_s29] sm:$0xff]  ;;  %s716_s10 = sshll.u32 %s957_s24, 2  ;;  %s923_s20 = scalar_lea.vmem %s949_s7, %s957_s24 }
  0x26   : > { %v421_v3 = vstv %s408_s15  ;;  %s402_s13 = scalar_lea.vmem %s948_s6, %s716_s10  ;;  %v420_v4 = vld [vmem:[%s387_s9] sm:$0xff]  ;;  %418 = vst.msk [vmem:[%s923_s20] sm:$0x1] %vm417_vm2, %v811_v22 }
  0x27   : > { %v543_v5 = vld [vmem:[%s402_s13] sm:$0xf]  ;;  %v427_v6 = vstv %s412_s16  ;;  %v422_v7 = vmul.f32 %v421_v3, %v419_v1  ;;  %v552_v32 = vcombine.high %v420_v4, %v420_v4 }
  0x28   : > { %546 = vperm.xlu0 %764, %v543_v5   ;;  %v428_v8 = vmul.f32 %v427_v6, %v426_v2 }
  0x29   : > { %v423_v9 = vstv %s410_s19 }
  0x2a   : > { %v424_v10 = vmul.f32 %v423_v9, %v420_v4  ;;  %v437_v11 = vcombine.high %v428_v8, %v428_v8  ;;  %v439_v12 = vpack.c.bf16 %v428_v8, %v428_v8 }
  0x2c   : > { %v425_v13 = vadd.f32 %v424_v10, %v422_v7  ;;  %v440_v14 = vpack.c.bf16 %v437_v11, %v437_v11  ;;  %v447_v15 = vsel %vm445_vm0, %v439_v12, 0 }
  0x2d   : > { %v556_v51 = vld [vmem:[%s923_s20] sm:$0x1] }
  0x2e   : > { %v431_v16 = vcombine.high %v425_v13, %v425_v13  ;;  %v433_v17 = vpack.c.bf16 %v425_v13, %v425_v13  ;;  %718 = vmatprep.subr.msk.bf16.mxu0 %vm445_vm0, %v440_v14 }
  0x2f   : > { %453 = vmatpush1.bf16.msra.mxu0 %v447_v15 }
  0x30   : > { %v434_v18 = vpack.c.bf16 %v431_v16, %v431_v16  ;;  %v497_v19 = vsel %vm445_vm0, %v433_v17, 0 }
  0x32   : > { %720 = vmatprep.subr.msk.bf16.mxu1 %vm445_vm0, %v434_v18  ;;  %719 = vmatmul.mubr.msk.bf16.vlgmr.msra.gmra.mrb[0].mxu0 %vm441_vm1, %v435_v20 }
  0x33   : > { %503 = vmatpush1.bf16.msra.mxu1 %v497_v19 }
  0x36   : > { %721 = vmatmul.mubr.msk.bf16.vlgmr.msra.gmra.mrb[0].mxu1 %vm441_vm1, %v429_v21 }
  0xa7   : > { %v547_v26 = vpop.permute.xlu0 %546 }
 0x105   : > { %v486_v23 = vpop.f32.mrb[0].mxu0 }
 0x106   : > { %v488_v24 = vpop.f32.mrb[1].mxu0 }
 0x107   : > { %v490_v25 = vpop.f32.mrb[2].mxu0 }
 0x108   : > { %v491_v28 = vpop.f32.mrb[3].mxu0 }
 0x109   : > { %v536_v27 = vpop.f32.mrb[0].mxu1 }
 0x10a   : > { %v537_v29 = vadd.f32 %v536_v27, %v486_v23  ;;  %v538_v30 = vpop.f32.mrb[1].mxu1 }
 0x10b   : > { %v539_v31 = vadd.f32 %v538_v30, %v488_v24  ;;  %v540_v33 = vpop.f32.mrb[2].mxu1 }
 0x10c   : > { %v549_v34 = vadd.f32 %v547_v26, %v537_v29  ;;  %v541_v35 = vpop.f32.mrb[3].mxu1 }
 0x10d   : > { %v550_v36 = vadd.f32 %v547_v26, %v539_v31 }
 0x10e   : > { %v554_v37 = vsub.f32 %v549_v34, %v420_v4 }
 0x10f   : > { %v555_v38 = vsub.f32 %v550_v36, %v552_v32 }
 0x110   : > { %v557_v39 = vmul.f32 %v554_v37, %v554_v37 }
 0x111   : > { %v558_v40 = vmul.f32 %v555_v38, %v555_v38 }
 0x112   : > { %v560_v41 = vsel %vm559_vm3, %v557_v39, 0.0 }
 0x113   : > { %v561_v42 = vsel %vm559_vm3, %v558_v40, 0.0 }
 0x114   : > { %v562_v43 = vadd.f32 %v561_v42, %v560_v41 }
 0x116   : > { %563 = vadd.xlane.f32.xlu0 %v562_v43 }
 0x1a3   : > { %v564_v44 = vpop.xlane.xlu0 %563 }
 0x1a4   : > { %v565_v45 = vsel %vm559_vm3, %v564_v44, 0.0 }
 0x1a5   : > { %v566_v46 = vrot.slane %v565_v45, 4 }
 0x1a7   : > { %v567_v47 = vadd.f32 %v566_v46, %v565_v45 }
 0x1a9   : > { %v568_v48 = vrot.slane %v567_v47, 2 }
 0x1ab   : > { %v569_v49 = vadd.f32 %v568_v48, %v567_v47 }
 0x1ad   : > { %v570_v50 = vrot.slane %v569_v49, 1 }
 0x1af   : > { %v571_v52 = vadd.f32 %v570_v50, %v569_v49 }
 0x1b1   : > { %v572_v53 = vadd.f32 %v571_v52, %v556_v51 }
 0x1b3   : > { %574 = vst.msk [vmem:[%s923_s20] sm:$0x1] %vm417_vm2, %v572_v53 }
 0x1ba   : > { %v578_v54 = vld [vmem:[%s923_s20] sm:$0x1] }
 0x1bb   : > { %v579_v55 = vmul.f32 0.0009765625, %v578_v54 }
 0x1bd   : > { %580 = vst.msk [vmem:[%s923_s20] sm:$0x1] %vm417_vm2, %v579_v55 }
 0x1be PF: > { %s18_s26 = sadd.s32 1, %s807_s26   ;;  %s952_s24 = smov %s803_s25 }
 0x1bf   : > { %p15_p2 = scmp.ge.s32.totalorder %s18_s26, 4   ;;  %s953_s25 = smov %s955_s28 }
 0x1c1   :  { %17 = sbr.rel (!%p15_p2) target bundleno = 2 (0x2), region = 100 }
 0x1c8   :  { %598 = vsyncpa [#allocation3], 1 }
 0x1c9   :  { %600 = vsyncpa [#allocation3 + $0x1], 1 }

</bundles_post_ra>
